<compile_context>
chip_gen: v7x
topology: tpu7x:2x2x1
jax: 0.10.0
libtpu: 0.0.40
codegen_flags: <defaults>
</compile_context>

<pallas_src>
import jax
import jax.numpy as jnp
from jax.experimental import pallas as pl
from jax.experimental.pallas import tpu as pltpu


def attention_kernel(hidden_ref, enc_ref, mask_ref, valid_ref,
                     wh_ref, we_ref, b_ref, v_ref,
                     out_ref, hidp_ref):
    """One (batch-tile, src-chunk) grid step of additive attention.

    hidden_ref : [TB, H]      decoder hidden state (input dtype)
    enc_ref    : [TB, SC, H]  encoder-outputs chunk (input dtype)
    mask_ref   : [TB, SC]     int32, nonzero = keep (lane padding is 0)
    valid_ref  : [1, Sp]      f32, 1.0 on real src positions, 0.0 on padding
    wh_ref     : [H, H]       W[:, :H].T  (contraction-major, for hidden)
    we_ref     : [H, H]       W[:, H:].T  (contraction-major, for enc)
    b_ref      : [1, H]       Linear bias
    v_ref      : [1, H]       scoring vector
    out_ref    : [TB, Sp]     resident across the src-chunk axis; holds raw
                              masked scores until the last chunk, then softmax
    hidp_ref   : [TB, H] f32  scratch: hidden @ W_h + b (once per batch tile)
    """
    TB, SC, H = enc_ref.shape
    Sp = out_ref.shape[1]
    j = pl.program_id(1)
    n_chunks = pl.num_programs(1)

    # Hidden projection: computed once per batch tile, reused for every chunk.
    @pl.when(j == 0)
    def _():
        hidp_ref[...] = (jnp.dot(hidden_ref[...], wh_ref[...],
                                 preferred_element_type=jnp.float32)
                         + b_ref[...].astype(jnp.float32))

    # enc @ W_e over flattened (TB*SC) rows.  SC % 8 == 0 and H is the full
    # lane dim, so these reshapes are layout-preserving (no VMEM copy).
    enc = enc_ref[...]
    enc_proj = jnp.dot(enc.reshape(TB * SC, H), we_ref[...],
                       preferred_element_type=jnp.float32)           # [TB*SC,H]

    # tanh + v-dot.  bf16 inputs run the elementwise path in bf16 (v6e/v7x
    # bf16 EUP/VPU, half the vreg traffic); f32 inputs stay f32 (exact match).
    elt_dtype = jnp.float32 if enc.dtype == jnp.float32 else enc.dtype
    pre = enc_proj.reshape(TB, SC, H) + hidp_ref[...][:, None, :]
    energy = jnp.tanh(pre.astype(elt_dtype))
    prod = energy * v_ref[...].astype(elt_dtype)
    score = jnp.sum(prod.astype(jnp.float32), axis=-1)               # [TB, SC]

    # masked_fill_(src_mask == 0, -1e10); lane padding has mask == 0 too.
    score = jnp.where(mask_ref[...] == 0, jnp.float32(-1e10), score)

    def softmax(s):
        m = jnp.max(s, axis=-1, keepdims=True)
        # Zero the lane-padding exactly so it never enters the denominator
        # (matches PyTorch even for a fully-masked row).
        e = jnp.exp(s - m) * valid_ref[...]
        return e / jnp.sum(e, axis=-1, keepdims=True)

    if SC == Sp:
        # Single chunk: finalize directly, no out_ref round trip.
        out_ref[...] = softmax(score)
    else:
        off = pl.multiple_of(j * SC, 128)
        out_ref[:, pl.ds(off, SC)] = score

        @pl.when(j == n_chunks - 1)
        def _():
            out_ref[...] = softmax(out_ref[...])


def attention(hidden, encoder_outputs, src_mask, W, b, v):
    """Forward of the PyTorch Attention module.

    hidden           [B, H]
    encoder_outputs  [B, S, H]
    src_mask         [B, S]   (nonzero = keep)
    W                [H, 2H]  nn.Linear(2H, H).weight
    b                [H]      nn.Linear(2H, H).bias
    v                [H]      scoring parameter
    returns          [B, S]   f32 attention weights (softmax over S)
    """
    B, S, H = encoder_outputs.shape
    in_dtype = encoder_outputs.dtype
    in_isz = jnp.dtype(in_dtype).itemsize

    # --- VMEM limit / budget derived from the actual chip (v7x: 64 MiB phys).
    try:
        vmem_cap = int(pltpu.get_tpu_info().vmem_capacity_bytes)
    except Exception:
        vmem_cap = 64 * 1024 * 1024
    vmem_limit = max(32 * 1024 * 1024,
                     min((vmem_cap * 3) // 4, 96 * 1024 * 1024))
    budget = (vmem_limit * 3) // 4            # headroom for compiler internals

    # --- pad src_len to a lane multiple -> lane-dense [TB, Sp] stores.
    Sp = 128 * pl.cdiv(S, 128)

    # Per-grid-step VMEM footprint model: double-buffered streams + the f32
    # enc_proj/energy intermediates + single-buffered resident weights.
    def block_bytes(tb, sc):
        enc_blk = 2 * tb * sc * H * in_isz            # enc stream, 2 buffers
        mask_blk = 2 * tb * sc * 4
        hid_blk = 2 * tb * H * in_isz
        out_blk = 2 * tb * Sp * 4
        inter = 2 * tb * sc * H * 4                   # enc_proj + energy (f32)
        weights = 2 * H * H * in_isz                  # Buffered(1) residents
        smalls = Sp * 4 + 3 * H * 4
        scratch = tb * H * 4                          # hid_proj
        return (enc_blk + mask_blk + hid_blk + out_blk + inter + weights
                + smalls + scratch)

    # --- choose the src chunk SC first (bounds VMEM independent of S) ...
    SC = Sp
    while SC > 128 and block_bytes(8, SC) > budget:
        cand = (SC // 2 // 128) * 128
        while cand >= 128 and Sp % cand:
            cand -= 128
        if cand < 128 or cand >= SC:
            break
        SC = cand

    # --- ... then grow the batch tile while it fits and keeps >=2 batch steps.
    TB = 8
    tb_cap = min(256, max(8, 8 * ((B + 15) // 16)))
    while TB * 2 <= tb_cap and block_bytes(TB * 2, SC) <= budget:
        TB *= 2

    # --- pad batch to a multiple of TB (never fall back to grid=(1,)).
    Bp = TB * pl.cdiv(B, TB)

    enc = encoder_outputs
    mask = src_mask.astype(jnp.int32)
    hid = hidden.astype(in_dtype)
    pad_b, pad_s = Bp - B, Sp - S
    if pad_b or pad_s:
        enc = jnp.pad(enc, ((0, pad_b), (0, pad_s), (0, 0)))
        mask = jnp.pad(mask, ((0, pad_b), (0, pad_s)))   # pads -> masked out
        hid = jnp.pad(hid, ((0, pad_b), (0, 0)))

    # Lane-validity vector (replaces per-step iota+compare inside the kernel).
    valid = (jnp.arange(Sp) < S).astype(jnp.float32).reshape(1, Sp)

    # Layout/dtype plumbing: split the 2H->H Linear, pre-transpose to
    # contraction-major, and cast params to the activation dtype (bf16 stays
    # bf16 into the MXU; f32 accumulation happens in-kernel).
    w_h = jnp.transpose(W[:, :H]).astype(in_dtype)
    w_e = jnp.transpose(W[:, H:]).astype(in_dtype)
    b2 = b.reshape(1, H).astype(in_dtype)
    v2 = v.reshape(1, H).astype(in_dtype)

    def resident_spec(shape):
        zeros = (0,) * len(shape)

        def idx(i, j):
            return zeros

        try:    # constant index_map -> single buffer is enough
            return pl.BlockSpec(shape, idx, pipeline_mode=pl.Buffered(1))
        except TypeError:  # older jax without pipeline_mode kwarg
            return pl.BlockSpec(shape, idx)

    grid = (Bp // TB, Sp // SC)

    out = pl.pallas_call(
        attention_kernel,
        out_shape=jax.ShapeDtypeStruct((Bp, Sp), jnp.float32),
        grid=grid,
        in_specs=[
            pl.BlockSpec((TB, H), lambda i, j: (i, 0)),           # hidden
            pl.BlockSpec((TB, SC, H), lambda i, j: (i, j, 0)),    # encoder_outputs
            pl.BlockSpec((TB, SC), lambda i, j: (i, j)),          # mask
            resident_spec((1, Sp)),                               # valid lanes
            resident_spec((H, H)),                                # w_h
            resident_spec((H, H)),                                # w_e
            resident_spec((1, H)),                                # bias
            resident_spec((1, H)),                                # v
        ],
        out_specs=pl.BlockSpec((TB, Sp), lambda i, j: (i, 0)),
        scratch_shapes=[pltpu.VMEM((TB, H), jnp.float32)],
        compiler_params=pltpu.CompilerParams(
            dimension_semantics=("parallel", "arbitrary"),
            vmem_limit_bytes=int(vmem_limit)),
    )(hid, enc, mask, valid, w_h, w_e, b2, v2)

    return out[:B, :S]


def attention_ref(hidden, encoder_outputs, src_mask, W, b, v):
    # plain-JAX reference mirroring the PyTorch forward
    B, S, H = encoder_outputs.shape
    hid = jnp.broadcast_to(hidden[:, None, :], (B, S, H))
    cat = jnp.concatenate([hid, encoder_outputs], axis=-1)
    energy = jnp.tanh(jnp.einsum("bsk,hk->bsh", cat, W) + b)
    score = jnp.einsum("bsh,h->bs", energy, v)
    score = jnp.where(src_mask == 0, -1e10, score)
    return jax.nn.softmax(score, axis=1)


if __name__ == "__main__":
    B, S, H = 2, 8, 32

    key = jax.random.PRNGKey(0)
    k_hid, k_enc, k_w, k_b, k_v = jax.random.split(key, 5)

    hidden = jax.random.normal(k_hid, (B, H), dtype=jnp.float32)
    encoder_outputs = jax.random.normal(k_enc, (B, S, H), dtype=jnp.float32)
    # mask: 1 = keep, 0 = pad (make some positions padded)
    src_mask = jnp.array([[1] * S, [1] * (S - 3) + [0] * 3], dtype=jnp.int32)

    # nn.Linear(2H, H): weight [H, 2H], bias [H]; v = torch.rand(H)
    lim = 1.0 / jnp.sqrt(2.0 * H)
    W = jax.random.uniform(k_w, (H, 2 * H), minval=-lim, maxval=lim,
                           dtype=jnp.float32)
    b = jax.random.uniform(k_b, (H,), minval=-lim, maxval=lim,
                           dtype=jnp.float32)
    v = jax.random.uniform(k_v, (H,), minval=0.0, maxval=1.0,
                           dtype=jnp.float32)

    out = attention(hidden, encoder_outputs, src_mask, W, b, v)
    out = jax.block_until_ready(out)

    ref = attention_ref(hidden, encoder_outputs, src_mask, W, b, v)
    assert out.shape == (B, S)
    assert jnp.allclose(out, ref, atol=1e-5, rtol=1e-5), "mismatch vs reference"
    assert jnp.allclose(jnp.sum(out, axis=1), 1.0, atol=1e-5)

    print("KERNEL_OK")
</pallas_src>

<mosaic_0001>
module attributes {stable_mosaic.version = 11 : i64} {
  func.func @attention_kernel(%arg0: i32, %arg1: i32, %arg2: memref<8x32xf32, #tpu.memory_space<vmem>>, %arg3: memref<8x128x32xf32, #tpu.memory_space<vmem>>, %arg4: memref<8x128xi32, #tpu.memory_space<vmem>>, %arg5: memref<1x128xf32, #tpu.memory_space<vmem>>, %arg6: memref<32x32xf32, #tpu.memory_space<vmem>>, %arg7: memref<32x32xf32, #tpu.memory_space<vmem>>, %arg8: memref<1x32xf32, #tpu.memory_space<vmem>>, %arg9: memref<1x32xf32, #tpu.memory_space<vmem>>, %arg10: memref<8x128xf32, #tpu.memory_space<vmem>>, %arg11: memref<8x32xf32, #tpu.memory_space<vmem>>) attributes {dimension_semantics = [#tpu.dimension_semantics<parallel>, #tpu.dimension_semantics<arbitrary>], iteration_bounds = array<i64: 1, 1>, scalar_prefetch = 0 : i64, scratch_operands = 1 : i64, tpu.core_type = #tpu.core_type<tc>, window_params = [{transform_indices = @transform_0, window_bounds = array<i64: 8, 32>}, {transform_indices = @transform_1, window_bounds = array<i64: 8, 128, 32>}, {transform_indices = @transform_2, window_bounds = array<i64: 8, 128>}, {pipeline_mode = #tpu.pipeline_mode<synchronous>, transform_indices = @transform_3, window_bounds = array<i64: 1, 128>}, {pipeline_mode = #tpu.pipeline_mode<synchronous>, transform_indices = @transform_4, window_bounds = array<i64: 32, 32>}, {pipeline_mode = #tpu.pipeline_mode<synchronous>, transform_indices = @transform_5, window_bounds = array<i64: 32, 32>}, {pipeline_mode = #tpu.pipeline_mode<synchronous>, transform_indices = @transform_6, window_bounds = array<i64: 1, 32>}, {pipeline_mode = #tpu.pipeline_mode<synchronous>, transform_indices = @transform_7, window_bounds = array<i64: 1, 32>}, {transform_indices = @transform_8, window_bounds = array<i64: 8, 128>}]} {
    %c0_i32 = arith.constant 0 : i32
    %0 = arith.cmpi eq, %arg1, %c0_i32 : i32
    %1 = arith.extui %0 : i1 to i32
    %c0_i32_0 = arith.constant 0 : i32
    %2 = arith.cmpi ne, %1, %c0_i32_0 : i32
    scf.if %2 {
      %c0_20 = arith.constant 0 : index
      %c0_21 = arith.constant 0 : index
      %36 = vector.load %arg2[%c0_20, %c0_21] : memref<8x32xf32, #tpu.memory_space<vmem>>, vector<8x32xf32>
      %c0_22 = arith.constant 0 : index
      %c0_23 = arith.constant 0 : index
      %37 = vector.load %arg6[%c0_22, %c0_23] : memref<32x32xf32, #tpu.memory_space<vmem>>, vector<32x32xf32>
      %cst_24 = arith.constant dense<0.000000e+00> : vector<8x32xf32>
      %38 = tpu.matmul %36, %37, %cst_24 {dimension_numbers = #tpu.dot_dimension_numbers<[1], [0], [0], [1], [0, 0, 1, 1], [], []>} : vector<8x32xf32>, vector<32x32xf32>, vector<8x32xf32> -> vector<8x32xf32>
      %c0_25 = arith.constant 0 : index
      %c0_26 = arith.constant 0 : index
      %39 = vector.load %arg8[%c0_25, %c0_26] : memref<1x32xf32, #tpu.memory_space<vmem>>, vector<1x32xf32>
      %40 = vector.broadcast %39 : vector<1x32xf32> to vector<8x32xf32>
      %41 = arith.addf %38, %40 : vector<8x32xf32>
      %c0_27 = arith.constant 0 : index
      %c0_28 = arith.constant 0 : index
      %42 = vector.load %arg11[%c0_27, %c0_28] : memref<8x32xf32, #tpu.memory_space<vmem>>, vector<8x32xf32>
      tpu.vector_store %arg11[%c0_27, %c0_28], %41 {strides = array<i32>} : memref<8x32xf32, #tpu.memory_space<vmem>>, vector<8x32xf32>,
    } else {
    }
    %c0 = arith.constant 0 : index
    %c0_1 = arith.constant 0 : index
    %c0_2 = arith.constant 0 : index
    %3 = vector.load %arg3[%c0, %c0_1, %c0_2] : memref<8x128x32xf32, #tpu.memory_space<vmem>>, vector<8x128x32xf32>
    %4 = vector.shape_cast %3 : vector<8x128x32xf32> to vector<1024x32xf32>
    %c0_3 = arith.constant 0 : index
    %c0_4 = arith.constant 0 : index
    %5 = vector.load %arg7[%c0_3, %c0_4] : memref<32x32xf32, #tpu.memory_space<vmem>>, vector<32x32xf32>
    %cst = arith.constant dense<0.000000e+00> : vector<1024x32xf32>
    %6 = tpu.matmul %4, %5, %cst {dimension_numbers = #tpu.dot_dimension_numbers<[1], [0], [0], [1], [0, 0, 1, 1], [], []>} : vector<1024x32xf32>, vector<32x32xf32>, vector<1024x32xf32> -> vector<1024x32xf32>
    %7 = vector.shape_cast %6 : vector<1024x32xf32> to vector<8x128x32xf32>
    %c0_5 = arith.constant 0 : index
    %c0_6 = arith.constant 0 : index
    %8 = vector.load %arg11[%c0_5, %c0_6] : memref<8x32xf32, #tpu.memory_space<vmem>>, vector<8x32xf32>
    %9 = vector.shape_cast %8 : vector<8x32xf32> to vector<8x1x32xf32>
    %10 = vector.broadcast %9 : vector<8x1x32xf32> to vector<8x128x32xf32>
    %11 = arith.addf %7, %10 : vector<8x128x32xf32>
    %12 = math.tanh %11 : vector<8x128x32xf32>
    %c0_7 = arith.constant 0 : index
    %c0_8 = arith.constant 0 : index
    %13 = vector.load %arg9[%c0_7, %c0_8] : memref<1x32xf32, #tpu.memory_space<vmem>>, vector<1x32xf32>
    %14 = vector.shape_cast %13 : vector<1x32xf32> to vector<1x1x32xf32>
    %15 = vector.broadcast %14 : vector<1x1x32xf32> to vector<8x128x32xf32>
    %16 = arith.mulf %12, %15 : vector<8x128x32xf32>
    %cst_9 = arith.constant dense<0.000000e+00> : vector<8x128xf32>
    %17 = vector.multi_reduction <add>, %16, %cst_9 [2] : vector<8x128x32xf32> to vector<8x128xf32>
    %c0_10 = arith.constant 0 : index
    %c0_11 = arith.constant 0 : index
    %18 = vector.load %arg4[%c0_10, %c0_11] : memref<8x128xi32, #tpu.memory_space<vmem>>, vector<8x128xi32>
    %c0_i32_12 = arith.constant 0 : i32
    %19 = vector.broadcast %c0_i32_12 : i32 to vector<8x128xi32>
    %20 = arith.cmpi eq, %18, %19 : vector<8x128xi32>
    %cst_13 = arith.constant -1.000000e+10 : f32
    %21 = vector.broadcast %cst_13 : f32 to vector<8x128xf32>
    %22 = arith.select %20, %21, %17 : vector<8x128xi1>, vector<8x128xf32>
    %cst_14 = arith.constant dense<0xFF800000> : vector<8xf32>
    %23 = vector.multi_reduction <maximumf>, %22, %cst_14 [1] : vector<8x128xf32> to vector<8xf32>
    %24 = vector.shape_cast %23 : vector<8xf32> to vector<8x1xf32>
    %25 = vector.broadcast %24 : vector<8x1xf32> to vector<8x128xf32>
    %26 = arith.subf %22, %25 : vector<8x128xf32>
    %27 = math.exp %26 : vector<8x128xf32>
    %c0_15 = arith.constant 0 : index
    %c0_16 = arith.constant 0 : index
    %28 = vector.load %arg5[%c0_15, %c0_16] : memref<1x128xf32, #tpu.memory_space<vmem>>, vector<1x128xf32>
    %29 = vector.broadcast %28 : vector<1x128xf32> to vector<8x128xf32>
    %30 = arith.mulf %27, %29 : vector<8x128xf32>
    %cst_17 = arith.constant dense<0.000000e+00> : vector<8xf32>
    %31 = vector.multi_reduction <add>, %30, %cst_17 [1] : vector<8x128xf32> to vector<8xf32>
    %32 = vector.shape_cast %31 : vector<8xf32> to vector<8x1xf32>
    %33 = vector.broadcast %32 : vector<8x1xf32> to vector<8x128xf32>
    %34 = arith.divf %30, %33 : vector<8x128xf32>
    %c0_18 = arith.constant 0 : index
    %c0_19 = arith.constant 0 : index
    %35 = vector.load %arg10[%c0_18, %c0_19] : memref<8x128xf32, #tpu.memory_space<vmem>>, vector<8x128xf32>
    tpu.vector_store %arg10[%c0_18, %c0_19], %34 {strides = array<i32>} : memref<8x128xf32, #tpu.memory_space<vmem>>, vector<8x128xf32>,
    return
  }
  func.func @transform_0(%arg0: i32, %arg1: i32) -> (i32, i32) {
    %c0_i32 = arith.constant 0 : i32
    %c0_i32_0 = arith.constant 0 : i32
    return %arg0, %c0_i32 : i32, i32
  }
  func.func @transform_1(%arg0: i32, %arg1: i32) -> (i32, i32, i32) {
    %c0_i32 = arith.constant 0 : i32
    %c0_i32_0 = arith.constant 0 : i32
    return %arg0, %arg1, %c0_i32 : i32, i32, i32
  }
  func.func @transform_2(%arg0: i32, %arg1: i32) -> (i32, i32) {
    %c0_i32 = arith.constant 0 : i32
    return %arg0, %arg1 : i32, i32
  }
  func.func @transform_3(%arg0: i32, %arg1: i32) -> (i32, i32) {
    %c0_i32 = arith.constant 0 : i32
    %c0_i32_0 = arith.constant 0 : i32
    %c0_i32_1 = arith.constant 0 : i32
    return %c0_i32, %c0_i32_0 : i32, i32
  }
  func.func @transform_4(%arg0: i32, %arg1: i32) -> (i32, i32) {
    %c0_i32 = arith.constant 0 : i32
    %c0_i32_0 = arith.constant 0 : i32
    %c0_i32_1 = arith.constant 0 : i32
    return %c0_i32, %c0_i32_0 : i32, i32
  }
  func.func @transform_5(%arg0: i32, %arg1: i32) -> (i32, i32) {
    %c0_i32 = arith.constant 0 : i32
    %c0_i32_0 = arith.constant 0 : i32
    %c0_i32_1 = arith.constant 0 : i32
    return %c0_i32, %c0_i32_0 : i32, i32
  }
  func.func @transform_6(%arg0: i32, %arg1: i32) -> (i32, i32) {
    %c0_i32 = arith.constant 0 : i32
    %c0_i32_0 = arith.constant 0 : i32
    %c0_i32_1 = arith.constant 0 : i32
    return %c0_i32, %c0_i32_0 : i32, i32
  }
  func.func @transform_7(%arg0: i32, %arg1: i32) -> (i32, i32) {
    %c0_i32 = arith.constant 0 : i32
    %c0_i32_0 = arith.constant 0 : i32
    %c0_i32_1 = arith.constant 0 : i32
    return %c0_i32, %c0_i32_0 : i32, i32
  }
  func.func @transform_8(%arg0: i32, %arg1: i32) -> (i32, i32) {
    %c0_i32 = arith.constant 0 : i32
    %c0_i32_0 = arith.constant 0 : i32
    return %arg0, %c0_i32 : i32, i32
  }
}

</mosaic_0001>

<bundles_post_ra>
// kernel: tpu_custom_call.1
= control target key start
LH: loop header
LB: loop body
LE: loop exit
PB: predicated region body
PF: predicated region fallthrough
CT: control target
= control target key end

     0   :  { %v3841_v3 = vmov 0.0|0.0   ;;  %vm3842_vm0 = vmmov 0   ;;  %v3843_v8 = vmov 0.0   ;;  %vm46_vm1 = vcmask 261120   ;;  %s5720_s0 = inlined_call_operand.vmem [shape: f32[8,32], index: 0, kind: input, shape index: {}]   ;;  %s5721_s1 = inlined_call_operand.vmem [shape: f32[8,128,32], index: 1, kind: input, shape index: {}]   ;;  %s5722_s2 = inlined_call_operand.vmem [shape: s32[8,128], index: 2, kind: input, shape index: {}]   ;;  %s5723_s3 = inlined_call_operand.vmem [shape: f32[1,128], index: 3, kind: input, shape index: {}]   ;;  %s5724_s4 = inlined_call_operand.vmem [shape: f32[32,32], index: 4, kind: input, shape index: {}]   ;;  %s5725_s5 = inlined_call_operand.vmem [shape: f32[32,32], index: 5, kind: input, shape index: {}]   ;;  %s5726_s6 = inlined_call_operand.vmem [shape: f32[1,32], index: 6, kind: input, shape index: {}]   ;;  %s5727_s7 = inlined_call_operand.vmem [shape: f32[1,32], index: 7, kind: input, shape index: {}]   ;;  %s5728_s8 = inlined_call_operand.hbm [shape: f32[8,128], index: 8, kind: output, shape index: {}]  }
   0x1   :  { %v35_v0 = vld [vmem:[%s5724_s4] sm:$0xff]  ;;  %v36_v1 = vld [vmem:[%s5724_s4 + $0x8] sm:$0xff]  ;;  %3531 = vmatprep.subr.bf16.mxu0 %v3841_v3  ;;  %v37_v6 = vld [vmem:[%s5724_s4 + $0x10] sm:$0xff]  ;;  %3328 = vmatprep.mubr.msk.f32.mxu0 %vm3842_vm0, %v3843_v8 }
   0x2   :  { %v249_v2 = vld [vmem:[%s5725_s5] sm:$0xff]  ;;  %v3532_v4 = vpack.c.bf16 %v36_v1, %v35_v0  ;;  %v250_v5 = vld [vmem:[%s5725_s5 + $0x8] sm:$0xff]  ;;  %v38_v7 = vld [vmem:[%s5724_s4 + $0x18] sm:$0xff] }
   0x3   :  { %v3537_v9 = vpack.c.bf16 %v250_v5, %v249_v2  ;;  %v251_v10 = vld [vmem:[%s5725_s5 + $0x10] sm:$0xff]  ;;  %v252_v11 = vld [vmem:[%s5725_s5 + $0x18] sm:$0xff]  ;;  %v3535_v12 = vpack.c.bf16 %v38_v7, %v37_v6  ;;  %v34_v15 = vld [vmem:[%s5720_s0] sm:$0xff] }
   0x4   :  { %3533 = vmatpush3.bf16.msra.mxu0 %v3532_v4  ;;  %v3541_v13 = vpack.c.bf16 %v252_v11, %v251_v10  ;;  %v183_v14 = vld [vmem:[%s5721_s1 + $0x1f0] sm:$0xff]  ;;  %v121_v16 = vld [vmem:[%s5721_s1] sm:$0xff]  ;;  %v184_v17 = vld [vmem:[%s5721_s1 + $0x1f8] sm:$0xff] }
   0x5   :  { %3545 = vmatprep.subr.bf16.mxu1 %v3537_v9  ;;  %3534 = vmatprep.subr.bf16.mxu0 %v3841_v3  ;;  %v185_v18 = vld [vmem:[%s5721_s1 + $0x200] sm:$0xff]  ;;  %v186_v19 = vld [vmem:[%s5721_s1 + $0x208] sm:$0xff]  ;;  %v187_v20 = vld [vmem:[%s5721_s1 + $0x210] sm:$0xff] }
   0x6   :  { %3547 = vmatpush3.bf16.msra.mxu1 %v3537_v9  ;;  %3432 = vmatprep.mubr.msk.f32.mxu1 %vm46_vm1, %v183_v14  ;;  %v122_v21 = vld [vmem:[%s5721_s1 + $0x8] sm:$0xff]  ;;  %v123_v22 = vld [vmem:[%s5721_s1 + $0x10] sm:$0xff]  ;;  %v188_v23 = vld [vmem:[%s5721_s1 + $0x218] sm:$0xff] }
   0x7   :  { %3546 = vmatprep.subr.bf16.mxu1 %v3541_v13  ;;  %v189_v24 = vld [vmem:[%s5721_s1 + $0x220] sm:$0xff]  ;;  %v124_v25 = vld [vmem:[%s5721_s1 + $0x18] sm:$0xff]  ;;  %v190_v27 = vld [vmem:[%s5721_s1 + $0x228] sm:$0xff] }
   0x8   :  { %3536 = vmatpush3.bf16.msra.mxu0 %v3535_v12  ;;  %v125_v26 = vld [vmem:[%s5721_s1 + $0x20] sm:$0xff]  ;;  %v191_v28 = vld [vmem:[%s5721_s1 + $0x230] sm:$0xff]  ;;  %v126_v29 = vld [vmem:[%s5721_s1 + $0x28] sm:$0xff] }
   0x9   :  { %3538 = vmatprep.subr.bf16.mxu0 %v3537_v9  ;;  %v127_v30 = vld [vmem:[%s5721_s1 + $0x30] sm:$0xff]  ;;  %v192_v31 = vld [vmem:[%s5721_s1 + $0x238] sm:$0xff]  ;;  %v193_v32 = vld [vmem:[%s5721_s1 + $0x240] sm:$0xff] }
   0xa   :  { %3548 = vmatpush3.bf16.msra.mxu1 %v3541_v13  ;;  %v128_v33 = vld [vmem:[%s5721_s1 + $0x38] sm:$0xff]  ;;  %v129_v34 = vld [vmem:[%s5721_s1 + $0x40] sm:$0xff]  ;;  %v194_v35 = vld [vmem:[%s5721_s1 + $0x248] sm:$0xff] }
   0xb   :  { %3329 = vmatmul.mubr.msk.f32.vlgmr.msra.gmra.mrb[0].mxu0 %vm46_vm1, %v34_v15  ;;  %v195_v36 = vld [vmem:[%s5721_s1 + $0x250] sm:$0xff]  ;;  %v130_v37 = vld [vmem:[%s5721_s1 + $0x48] sm:$0xff]  ;;  %v196_v39 = vld [vmem:[%s5721_s1 + $0x258] sm:$0xff] }
   0xc   :  { %3540 = vmatpush3.bf16.msra.mxu0 %v3537_v9  ;;  %3339 = vmatprep.mubr.msk.f32.mxu0 %vm46_vm1, %v121_v16  ;;  %v131_v38 = vld [vmem:[%s5721_s1 + $0x50] sm:$0xff]  ;;  %v197_v40 = vld [vmem:[%s5721_s1 + $0x260] sm:$0xff]  ;;  %v132_v41 = vld [vmem:[%s5721_s1 + $0x58] sm:$0xff] }
   0xd   :  { %3433 = vmatmul.mubr.msk.f32.vlgmr.msra.gmra.mrb[0].mxu1 %vm46_vm1, %v184_v17  ;;  %3542 = vmatprep.subr.bf16.mxu0 %v3541_v13  ;;  %v133_v42 = vld [vmem:[%s5721_s1 + $0x60] sm:$0xff]  ;;  %v198_v43 = vld [vmem:[%s5721_s1 + $0x268] sm:$0xff]  ;;  %v199_v44 = vld [vmem:[%s5721_s1 + $0x270] sm:$0xff] }
   0xe   :  { %3435 = vmatprep.mubr.msk.f32.mxu1 %vm46_vm1, %v185_v18  ;;  %v134_v45 = vld [vmem:[%s5721_s1 + $0x68] sm:$0xff]  ;;  %v135_v46 = vld [vmem:[%s5721_s1 + $0x70] sm:$0xff]  ;;  %v200_v47 = vld [vmem:[%s5721_s1 + $0x278] sm:$0xff] }
   0xf   :  { %v201_v48 = vld [vmem:[%s5721_s1 + $0x280] sm:$0xff]  ;;  %v136_v49 = vld [vmem:[%s5721_s1 + $0x78] sm:$0xff]  ;;  %v202_v51 = vld [vmem:[%s5721_s1 + $0x288] sm:$0xff] }
  0x10   :  { %3544 = vmatpush3.bf16.msra.mxu0 %v3541_v13  ;;  %v137_v50 = vld [vmem:[%s5721_s1 + $0x80] sm:$0xff]  ;;  %v203_v52 = vld [vmem:[%s5721_s1 + $0x290] sm:$0xff] }
  0x11   :  { %3436 = vmatmul.mubr.msk.f32.gmra.mrb[2].mxu1 %vm46_vm1, %v186_v19 }
  0x12   :  { %3438 = vmatprep.mubr.msk.f32.mxu1 %vm46_vm1, %v187_v20 }
  0x13   :  { %3340 = vmatmul.mubr.msk.f32.vlgmr.msra.gmra.mrb[2].mxu0 %vm46_vm1, %v122_v21 }
  0x14   :  { %3342 = vmatprep.mubr.msk.f32.mxu0 %vm46_vm1, %v123_v22 }
  0x15   :  { %3439 = vmatmul.mubr.msk.f32.gmra.mrb[4].mxu1 %vm46_vm1, %v188_v23 }
  0x16   :  { %3441 = vmatprep.mubr.msk.f32.mxu1 %vm46_vm1, %v189_v24 }
  0x17   :  { %3343 = vmatmul.mubr.msk.f32.gmra.mrb[4].mxu0 %vm46_vm1, %v124_v25 }
  0x18   :  { %3345 = vmatprep.mubr.msk.f32.mxu0 %vm46_vm1, %v125_v26 }
  0x19   :  { %3442 = vmatmul.mubr.msk.f32.gmra.mrb[6].mxu1 %vm46_vm1, %v190_v27 }
  0x1a   :  { %3444 = vmatprep.mubr.msk.f32.mxu1 %vm46_vm1, %v191_v28 }
  0x1b   :  { %3346 = vmatmul.mubr.msk.f32.gmra.mrb[6].mxu0 %vm46_vm1, %v126_v29 }
  0x1c   :  { %3348 = vmatprep.mubr.msk.f32.mxu0 %vm46_vm1, %v127_v30 }
  0x1d   :  { %3445 = vmatmul.mubr.msk.f32.gmra.mrb[8].mxu1 %vm46_vm1, %v192_v31 }
  0x1e   :  { %3447 = vmatprep.mubr.msk.f32.mxu1 %vm46_vm1, %v193_v32 }
  0x1f   :  { %3349 = vmatmul.mubr.msk.f32.gmra.mrb[8].mxu0 %vm46_vm1, %v128_v33 }
  0x20   :  { %3351 = vmatprep.mubr.msk.f32.mxu0 %vm46_vm1, %v129_v34 }
  0x21   :  { %3448 = vmatmul.mubr.msk.f32.gmra.mrb[10].mxu1 %vm46_vm1, %v194_v35 }
  0x22   :  { %3450 = vmatprep.mubr.msk.f32.mxu1 %vm46_vm1, %v195_v36 }
  0x23   :  { %3352 = vmatmul.mubr.msk.f32.gmra.mrb[10].mxu0 %vm46_vm1, %v130_v37 }
  0x24   :  { %3354 = vmatprep.mubr.msk.f32.mxu0 %vm46_vm1, %v131_v38 }
  0x25   :  { %3451 = vmatmul.mubr.msk.f32.gmra.mrb[12].mxu1 %vm46_vm1, %v196_v39 }
  0x26   :  { %3453 = vmatprep.mubr.msk.f32.mxu1 %vm46_vm1, %v197_v40 }
  0x27   :  { %3355 = vmatmul.mubr.msk.f32.gmra.mrb[12].mxu0 %vm46_vm1, %v132_v41 }
  0x28   :  { %3357 = vmatprep.mubr.msk.f32.mxu0 %vm46_vm1, %v133_v42 }
  0x29   :  { %3454 = vmatmul.mubr.msk.f32.gmra.mrb[14].mxu1 %vm46_vm1, %v198_v43 }
  0x2a   :  { %3456 = vmatprep.mubr.msk.f32.mxu1 %vm46_vm1, %v199_v44 }
  0x2b   :  { %3358 = vmatmul.mubr.msk.f32.gmra.mrb[14].mxu0 %vm46_vm1, %v134_v45 }
  0x2c   :  { %3360 = vmatprep.mubr.msk.f32.mxu0 %vm46_vm1, %v135_v46 }
  0x2d   :  { %3457 = vmatmul.mubr.msk.f32.gmra.mrb[16].mxu1 %vm46_vm1, %v200_v47 }
  0x2e   :  { %3459 = vmatprep.mubr.msk.f32.mxu1 %vm46_vm1, %v201_v48 }
  0x2f   :  { %3361 = vmatmul.mubr.msk.f32.gmra.mrb[16].mxu0 %vm46_vm1, %v136_v49 }
  0x30   :  { %13 = vsyncpa [#allocation4], 0  ;;  %3363 = vmatprep.mubr.msk.f32.mxu0 %vm46_vm1, %v137_v50  ;;  %v138_v53 = vld [vmem:[%s5721_s1 + $0x88] sm:$0xff]  ;;  %v139_v54 = vld [vmem:[%s5721_s1 + $0x90] sm:$0xff]  ;;  %vm2350_vm2 = vcmask 130112   ;;  %vm2357_vm3 = vcmask 195712  }
  0x31   :  { %3460 = vmatmul.mubr.msk.f32.gmra.mrb[18].mxu1 %vm46_vm1, %v202_v51  ;;  %v204_v55 = vld [vmem:[%s5721_s1 + $0x298] sm:$0xff]  ;;  %v205_v56 = vld [vmem:[%s5721_s1 + $0x2a0] sm:$0xff]  ;;  %v206_v59 = vld [vmem:[%s5721_s1 + $0x2a8] sm:$0xff]  ;;  %vm2364_vm4 = vcmask 261312   ;;  %vm2371_vm5 = vcmask 326912   ;;  %vm2378_vm6 = vcmask 392512  }
  0x32   :  { %3462 = vmatprep.mubr.msk.f32.mxu1 %vm46_vm1, %v203_v52  ;;  %v140_v57 = vld [vmem:[%s5721_s1 + $0x98] sm:$0xff]  ;;  %v141_v58 = vld [vmem:[%s5721_s1 + $0xa0] sm:$0xff]  ;;  %v207_v60 = vld [vmem:[%s5721_s1 + $0x2b0] sm:$0xff]  ;;  %vm2385_vm7 = vcmask 458112   ;;  %vm2392_vm8 = vcmask 523712   ;;  %vm2399_vm9 = vcmask 589312  }
  0x33   :  { %3364 = vmatmul.mubr.msk.f32.gmra.mrb[18].mxu0 %vm46_vm1, %v138_v53  ;;  %v142_v61 = vld [vmem:[%s5721_s1 + $0xa8] sm:$0xff]  ;;  %v143_v62 = vld [vmem:[%s5721_s1 + $0xb0] sm:$0xff]  ;;  %v208_v63 = vld [vmem:[%s5721_s1 + $0x2b8] sm:$0xff]  ;;  %vm2406_vm10 = vcmask 654912   ;;  %vm2413_vm11 = vcmask 720512   ;;  %vm2420_vm12 = vcmask 786112  }
  0x34   :  { %3366 = vmatprep.mubr.msk.f32.mxu0 %vm46_vm1, %v139_v54  ;;  %v209_v0 = vld [vmem:[%s5721_s1 + $0x2c0] sm:$0xff]  ;;  %v144_v1 = vld [vmem:[%s5721_s1 + $0xb8] sm:$0xff]  ;;  %v210_v3 = vld [vmem:[%s5721_s1 + $0x2c8] sm:$0xff]  ;;  %vm2427_vm13 = vcmask 851712   ;;  %vm2434_vm14 = vcmask 917312   ;;  %vm2441_vm15 = vcmask 982912  }
  0x35   :  { %3463 = vmatmul.mubr.msk.f32.gmra.mrb[20].mxu1 %vm46_vm1, %v204_v55  ;;  %v145_v2 = vld [vmem:[%s5721_s1 + $0xc0] sm:$0xff]  ;;  %v211_v4 = vld [vmem:[%s5721_s1 + $0x2d0] sm:$0xff]  ;;  %v146_v5 = vld [vmem:[%s5721_s1 + $0xc8] sm:$0xff]  ;;  %vm2448_vm0 = vcmask 1048512   ;;  %s3845_s12 = smov [#allocation3]  }
  0x36   :  { %3465 = vmatprep.mubr.msk.f32.mxu1 %vm46_vm1, %v205_v56  ;;  %v147_v6 = vld [vmem:[%s5721_s1 + $0xd0] sm:$0xff]  ;;  %v212_v7 = vld [vmem:[%s5721_s1 + $0x2d8] sm:$0xff]  ;;  %v213_v8 = vld [vmem:[%s5721_s1 + $0x2e0] sm:$0xff]  ;;  %s3043_s13 = sshll.u32 %s3845_s12, 4  ;;  %s3044_s13 = int_to_ptr.vmem [resolvable:$true] %s3043_s13 }
  0x37   :  { %3367 = vmatmul.mubr.msk.f32.gmra.mrb[20].mxu0 %vm46_vm1, %v140_v57  ;;  %v148_v9 = vld [vmem:[%s5721_s1 + $0xd8] sm:$0xff]  ;;  %v149_v10 = vld [vmem:[%s5721_s1 + $0xe0] sm:$0xff]  ;;  %v214_v11 = vld [vmem:[%s5721_s1 + $0x2e8] sm:$0xff]  ;;  %s3817_s14 = scalar_lea.vmem %s3044_s13, 128  ;;  %p3822_p1 = scmp.lt.s32.totalorder %s3044_s13, %s3044_s13 }
  0x38   :  { %3369 = vmatprep.mubr.msk.f32.mxu0 %vm46_vm1, %v141_v58  ;;  %v215_v12 = vld [vmem:[%s5721_s1 + $0x2f0] sm:$0xff]  ;;  %v150_v13 = vld [vmem:[%s5721_s1 + $0xe8] sm:$0xff]  ;;  %v216_v15 = vld [vmem:[%s5721_s1 + $0x2f8] sm:$0xff]  ;;  %p3818_p0 = scmp.ne.s32.totalorder %s3044_s13, %s3817_s14  ;;  %p3823_p2 = scmp.lt.s32.totalorder %s3817_s14, %s3817_s14 }
  0x39   :  { %3466 = vmatmul.mubr.msk.f32.gmra.mrb[22].mxu1 %vm46_vm1, %v206_v59  ;;  %v151_v14 = vld [vmem:[%s5721_s1 + $0xf0] sm:$0xff]  ;;  %v217_v16 = vld [vmem:[%s5721_s1 + $0x300] sm:$0xff]  ;;  %v152_v17 = vld [vmem:[%s5721_s1 + $0xf8] sm:$0xff] }
  0x3a   :  { %3468 = vmatprep.mubr.msk.f32.mxu1 %vm46_vm1, %v207_v60  ;;  %v153_v18 = vld [vmem:[%s5721_s1 + $0x100] sm:$0xff]  ;;  %v218_v19 = vld [vmem:[%s5721_s1 + $0x308] sm:$0xff]  ;;  %v219_v20 = vld [vmem:[%s5721_s1 + $0x310] sm:$0xff]  ;;  %p3824_p3 = por %p3823_p2, %p3822_p1 }
  0x3b   :  { %3370 = vmatmul.mubr.msk.f32.gmra.mrb[22].mxu0 %vm46_vm1, %v142_v61  ;;  %v154_v21 = vld [vmem:[%s5721_s1 + $0x108] sm:$0xff]  ;;  %v155_v22 = vld [vmem:[%s5721_s1 + $0x110] sm:$0xff]  ;;  %v220_v23 = vld [vmem:[%s5721_s1 + $0x318] sm:$0xff] }
  0x3c   :  { %3372 = vmatprep.mubr.msk.f32.mxu0 %vm46_vm1, %v143_v62  ;;  %v221_v24 = vld [vmem:[%s5721_s1 + $0x320] sm:$0xff]  ;;  %v156_v25 = vld [vmem:[%s5721_s1 + $0x118] sm:$0xff]  ;;  %v222_v27 = vld [vmem:[%s5721_s1 + $0x328] sm:$0xff]  ;;  %p3825_p4 = pnand %p3824_p3, %p3818_p0 }
  0x3d   :  { %3469 = vmatmul.mubr.msk.f32.gmra.mrb[24].mxu1 %vm46_vm1, %v208_v63  ;;  %v157_v26 = vld [vmem:[%s5721_s1 + $0x120] sm:$0xff]  ;;  %v223_v28 = vld [vmem:[%s5721_s1 + $0x330] sm:$0xff]  ;;  %v158_v29 = vld [vmem:[%s5721_s1 + $0x128] sm:$0xff] }
  0x3e   :  { %3471 = vmatprep.mubr.msk.f32.mxu1 %vm46_vm1, %v209_v0  ;;  %v159_v30 = vld [vmem:[%s5721_s1 + $0x130] sm:$0xff]  ;;  %v224_v31 = vld [vmem:[%s5721_s1 + $0x338] sm:$0xff]  ;;  %v225_v32 = vld [vmem:[%s5721_s1 + $0x340] sm:$0xff] }
  0x3f   :  { %3373 = vmatmul.mubr.msk.f32.gmra.mrb[24].mxu0 %vm46_vm1, %v144_v1  ;;  %v160_v33 = vld [vmem:[%s5721_s1 + $0x138] sm:$0xff]  ;;  %v161_v34 = vld [vmem:[%s5721_s1 + $0x140] sm:$0xff]  ;;  %v226_v35 = vld [vmem:[%s5721_s1 + $0x348] sm:$0xff] }
  0x40   :  { %3375 = vmatprep.mubr.msk.f32.mxu0 %vm46_vm1, %v145_v2  ;;  %v227_v36 = vld [vmem:[%s5721_s1 + $0x350] sm:$0xff]  ;;  %v162_v37 = vld [vmem:[%s5721_s1 + $0x148] sm:$0xff]  ;;  %v228_v39 = vld [vmem:[%s5721_s1 + $0x358] sm:$0xff] }
  0x41   :  { %3472 = vmatmul.mubr.msk.f32.gmra.mrb[26].mxu1 %vm46_vm1, %v210_v3  ;;  %v163_v38 = vld [vmem:[%s5721_s1 + $0x150] sm:$0xff]  ;;  %v229_v40 = vld [vmem:[%s5721_s1 + $0x360] sm:$0xff]  ;;  %v164_v41 = vld [vmem:[%s5721_s1 + $0x158] sm:$0xff] }
  0x42   :  { %3474 = vmatprep.mubr.msk.f32.mxu1 %vm46_vm1, %v211_v4  ;;  %v165_v42 = vld [vmem:[%s5721_s1 + $0x160] sm:$0xff]  ;;  %v230_v43 = vld [vmem:[%s5721_s1 + $0x368] sm:$0xff]  ;;  %v231_v44 = vld [vmem:[%s5721_s1 + $0x370] sm:$0xff] }
  0x43   :  { %3376 = vmatmul.mubr.msk.f32.gmra.mrb[26].mxu0 %vm46_vm1, %v146_v5  ;;  %v166_v45 = vld [vmem:[%s5721_s1 + $0x168] sm:$0xff]  ;;  %v167_v46 = vld [vmem:[%s5721_s1 + $0x170] sm:$0xff]  ;;  %v232_v47 = vld [vmem:[%s5721_s1 + $0x378] sm:$0xff] }
  0x44   :  { %3378 = vmatprep.mubr.msk.f32.mxu0 %vm46_vm1, %v147_v6  ;;  %v233_v48 = vld [vmem:[%s5721_s1 + $0x380] sm:$0xff]  ;;  %v168_v49 = vld [vmem:[%s5721_s1 + $0x178] sm:$0xff]  ;;  %v234_v51 = vld [vmem:[%s5721_s1 + $0x388] sm:$0xff] }
  0x45   :  { %3475 = vmatmul.mubr.msk.f32.gmra.mrb[28].mxu1 %vm46_vm1, %v212_v7  ;;  %v169_v50 = vld [vmem:[%s5721_s1 + $0x180] sm:$0xff]  ;;  %v235_v52 = vld [vmem:[%s5721_s1 + $0x390] sm:$0xff]  ;;  %v170_v53 = vld [vmem:[%s5721_s1 + $0x188] sm:$0xff] }
  0x46   :  { %3477 = vmatprep.mubr.msk.f32.mxu1 %vm46_vm1, %v213_v8  ;;  %v171_v54 = vld [vmem:[%s5721_s1 + $0x190] sm:$0xff]  ;;  %v236_v55 = vld [vmem:[%s5721_s1 + $0x398] sm:$0xff]  ;;  %v237_v56 = vld [vmem:[%s5721_s1 + $0x3a0] sm:$0xff] }
  0x47   :  { %3379 = vmatmul.mubr.msk.f32.gmra.mrb[28].mxu0 %vm46_vm1, %v148_v9  ;;  %v172_v57 = vld [vmem:[%s5721_s1 + $0x198] sm:$0xff]  ;;  %v173_v58 = vld [vmem:[%s5721_s1 + $0x1a0] sm:$0xff]  ;;  %v238_v59 = vld [vmem:[%s5721_s1 + $0x3a8] sm:$0xff] }
  0x48   :  { %3381 = vmatprep.mubr.msk.f32.mxu0 %vm46_vm1, %v149_v10  ;;  %v239_v60 = vld [vmem:[%s5721_s1 + $0x3b0] sm:$0xff]  ;;  %v174_v61 = vld [vmem:[%s5721_s1 + $0x1a8] sm:$0xff]  ;;  %v240_v63 = vld [vmem:[%s5721_s1 + $0x3b8] sm:$0xff] }
  0x49   :  { %3478 = vmatmul.mubr.msk.f32.gmra.mrb[30].mxu1 %vm46_vm1, %v214_v11  ;;  %v175_v62 = vld [vmem:[%s5721_s1 + $0x1b0] sm:$0xff]  ;;  %v241_v0 = vld [vmem:[%s5721_s1 + $0x3c0] sm:$0xff]  ;;  %v176_v1 = vld [vmem:[%s5721_s1 + $0x1b8] sm:$0xff] }
  0x4a   :  { %3480 = vmatprep.mubr.msk.f32.mxu1 %vm46_vm1, %v215_v12  ;;  %v177_v2 = vld [vmem:[%s5721_s1 + $0x1c0] sm:$0xff]  ;;  %v242_v3 = vld [vmem:[%s5721_s1 + $0x3c8] sm:$0xff]  ;;  %v243_v4 = vld [vmem:[%s5721_s1 + $0x3d0] sm:$0xff] }
  0x4b   :  { %3382 = vmatmul.mubr.msk.f32.gmra.mrb[30].mxu0 %vm46_vm1, %v150_v13  ;;  %v178_v5 = vld [vmem:[%s5721_s1 + $0x1c8] sm:$0xff]  ;;  %v179_v6 = vld [vmem:[%s5721_s1 + $0x1d0] sm:$0xff]  ;;  %v244_v7 = vld [vmem:[%s5721_s1 + $0x3d8] sm:$0xff] }
  0x4c   :  { %3384 = vmatprep.mubr.msk.f32.mxu0 %vm46_vm1, %v151_v14  ;;  %v245_v8 = vld [vmem:[%s5721_s1 + $0x3e0] sm:$0xff]  ;;  %v180_v9 = vld [vmem:[%s5721_s1 + $0x1d8] sm:$0xff]  ;;  %v246_v11 = vld [vmem:[%s5721_s1 + $0x3e8] sm:$0xff] }
  0x4d   :  { %3481 = vmatmul.mubr.msk.f32.gmra.mrb[32].mxu1 %vm46_vm1, %v216_v15  ;;  %v181_v10 = vld [vmem:[%s5721_s1 + $0x1e0] sm:$0xff]  ;;  %v247_v12 = vld [vmem:[%s5721_s1 + $0x3f0] sm:$0xff]  ;;  %v182_v13 = vld [vmem:[%s5721_s1 + $0x1e8] sm:$0xff] }
  0x4e   :  { %3483 = vmatprep.mubr.msk.f32.mxu1 %vm46_vm1, %v217_v16  ;;  %v248_v14 = vld [vmem:[%s5721_s1 + $0x3f8] sm:$0xff]  ;;  %v3051_v15 = vld [vmem:[%s5726_s6] ss:$0 sm:$0xff]  ;;  %v3844_v16 = vmov 1966171168  }
  0x4f   :  { %3385 = vmatmul.mubr.msk.f32.gmra.mrb[32].mxu0 %vm46_vm1, %v152_v17  ;;  %v1347_v17 = vunpack.c.l.s4 %v3844_v16 }
  0x50   :  { %3387 = vmatprep.mubr.msk.f32.mxu0 %vm46_vm1, %v153_v18  ;;  %v5729_v18 = vlaneseq }
  0x51   :  { %3484 = vmatmul.mubr.msk.f32.gmra.mrb[34].mxu1 %vm46_vm1, %v218_v19 }
  0x52   :  { %3486 = vmatprep.mubr.msk.f32.mxu1 %vm46_vm1, %v219_v20 }
  0x53   :  { %3388 = vmatmul.mubr.msk.f32.gmra.mrb[34].mxu0 %vm46_vm1, %v154_v21 }
  0x54   :  { %3390 = vmatprep.mubr.msk.f32.mxu0 %vm46_vm1, %v155_v22 }
  0x55   :  { %3487 = vmatmul.mubr.msk.f32.gmra.mrb[36].mxu1 %vm46_vm1, %v220_v23  ;;  %v1348_v23 = vunpack.c.0.s8 %v1347_v17 }
  0x56   :  { %3489 = vmatprep.mubr.msk.f32.mxu1 %vm46_vm1, %v221_v24  ;;  %v4438_v24 = vshrl.u32 %v5729_v18, 7 }
  0x57   :  { %3391 = vmatmul.mubr.msk.f32.gmra.mrb[36].mxu0 %vm46_vm1, %v156_v25 }
  0x58   :  { %3393 = vmatprep.mubr.msk.f32.mxu0 %vm46_vm1, %v157_v26  ;;  %5734 = vst [vmem:[#allocation6_spill] sm:$0xff] %v4438_v24 }
  0x59   :  { %3490 = vmatmul.mubr.msk.f32.gmra.mrb[38].mxu1 %vm46_vm1, %v222_v27  ;;  %v4443_v27 = vsub.s32 %v1348_v23, %v4438_v24 }
  0x5a   :  { %3492 = vmatprep.mubr.msk.f32.mxu1 %vm46_vm1, %v223_v28 }
  0x5b   :  { %3394 = vmatmul.mubr.msk.f32.gmra.mrb[38].mxu0 %vm46_vm1, %v158_v29 }
  0x5c   :  { %3396 = vmatprep.mubr.msk.f32.mxu0 %vm46_vm1, %v159_v30 }
  0x5d   :  { %3493 = vmatmul.mubr.msk.f32.gmra.mrb[40].mxu1 %vm46_vm1, %v224_v31 }
  0x5e   :  { %3495 = vmatprep.mubr.msk.f32.mxu1 %vm46_vm1, %v225_v32 }
  0x5f   :  { %3397 = vmatmul.mubr.msk.f32.gmra.mrb[40].mxu0 %vm46_vm1, %v160_v33 }
  0x60   :  { %3399 = vmatprep.mubr.msk.f32.mxu0 %vm46_vm1, %v161_v34 }
  0x61   :  { %3496 = vmatmul.mubr.msk.f32.gmra.mrb[42].mxu1 %vm46_vm1, %v226_v35 }
  0x62   :  { %3498 = vmatprep.mubr.msk.f32.mxu1 %vm46_vm1, %v227_v36  ;;  %v4449_v36 = vsub.s32 0, %v4438_v24 }
  0x63   :  { %3400 = vmatmul.mubr.msk.f32.gmra.mrb[42].mxu0 %vm46_vm1, %v162_v37 }
  0x64   :  { %3402 = vmatprep.mubr.msk.f32.mxu0 %vm46_vm1, %v163_v38 }
  0x65   :  { %3499 = vmatmul.mubr.msk.f32.gmra.mrb[44].mxu1 %vm46_vm1, %v228_v39 }
  0x66   :  { %3501 = vmatprep.mubr.msk.f32.mxu1 %vm46_vm1, %v229_v40 }
  0x67   :  { %3403 = vmatmul.mubr.msk.f32.gmra.mrb[44].mxu0 %vm46_vm1, %v164_v41 }
  0x68   :  { %3405 = vmatprep.mubr.msk.f32.mxu0 %vm46_vm1, %v165_v42 }
  0x69   :  { %3502 = vmatmul.mubr.msk.f32.gmra.mrb[46].mxu1 %vm46_vm1, %v230_v43 }
  0x6a   :  { %3504 = vmatprep.mubr.msk.f32.mxu1 %vm46_vm1, %v231_v44 }
  0x6b   :  { %3406 = vmatmul.mubr.msk.f32.gmra.mrb[46].mxu0 %vm46_vm1, %v166_v45 }
  0x6c   :  { %3408 = vmatprep.mubr.msk.f32.mxu0 %vm46_vm1, %v167_v46 }
  0x6d   :  { %3505 = vmatmul.mubr.msk.f32.gmra.mrb[48].mxu1 %vm46_vm1, %v232_v47 }
  0x6e   :  { %3507 = vmatprep.mubr.msk.f32.mxu1 %vm46_vm1, %v233_v48 }
  0x6f   :  { %3409 = vmatmul.mubr.msk.f32.gmra.mrb[48].mxu0 %vm46_vm1, %v168_v49 }
  0x70   :  { %3411 = vmatprep.mubr.msk.f32.mxu0 %vm46_vm1, %v169_v50 }
  0x71   :  { %3508 = vmatmul.mubr.msk.f32.gmra.mrb[50].mxu1 %vm46_vm1, %v234_v51 }
  0x72   :  { %3510 = vmatprep.mubr.msk.f32.mxu1 %vm46_vm1, %v235_v52 }
  0x73   :  { %3412 = vmatmul.mubr.msk.f32.gmra.mrb[50].mxu0 %vm46_vm1, %v170_v53 }
  0x74   :  { %3414 = vmatprep.mubr.msk.f32.mxu0 %vm46_vm1, %v171_v54 }
  0x75   :  { %3511 = vmatmul.mubr.msk.f32.gmra.mrb[52].mxu1 %vm46_vm1, %v236_v55 }
  0x76   :  { %3513 = vmatprep.mubr.msk.f32.mxu1 %vm46_vm1, %v237_v56 }
  0x77   :  { %3415 = vmatmul.mubr.msk.f32.gmra.mrb[52].mxu0 %vm46_vm1, %v172_v57 }
  0x78   :  { %3417 = vmatprep.mubr.msk.f32.mxu0 %vm46_vm1, %v173_v58 }
  0x79   :  { %3514 = vmatmul.mubr.msk.f32.gmra.mrb[54].mxu1 %vm46_vm1, %v238_v59 }
  0x7a   :  { %3516 = vmatprep.mubr.msk.f32.mxu1 %vm46_vm1, %v239_v60 }
  0x7b   :  { %3418 = vmatmul.mubr.msk.f32.gmra.mrb[54].mxu0 %vm46_vm1, %v174_v61 }
  0x7c   :  { %3420 = vmatprep.mubr.msk.f32.mxu0 %vm46_vm1, %v175_v62 }
  0x7d   :  { %3517 = vmatmul.mubr.msk.f32.gmra.mrb[56].mxu1 %vm46_vm1, %v240_v63 }
  0x7e   :  { %3519 = vmatprep.mubr.msk.f32.mxu1 %vm46_vm1, %v241_v0 }
  0x7f   :  { %3421 = vmatmul.mubr.msk.f32.gmra.mrb[56].mxu0 %vm46_vm1, %v176_v1 }
  0x80   :  { %3423 = vmatprep.mubr.msk.f32.mxu0 %vm46_vm1, %v177_v2 }
  0x81   :  { %3520 = vmatmul.mubr.msk.f32.gmra.mrb[58].mxu1 %vm46_vm1, %v242_v3 }
  0x82   :  { %3522 = vmatprep.mubr.msk.f32.mxu1 %vm46_vm1, %v243_v4 }
  0x83   :  { %3424 = vmatmul.mubr.msk.f32.gmra.mrb[58].mxu0 %vm46_vm1, %v178_v5 }
  0x84   :  { %3426 = vmatprep.mubr.msk.f32.mxu0 %vm46_vm1, %v179_v6 }
  0x85   :  { %3523 = vmatmul.mubr.msk.f32.gmra.mrb[60].mxu1 %vm46_vm1, %v244_v7 }
  0x86   :  { %3525 = vmatprep.mubr.msk.f32.mxu1 %vm46_vm1, %v245_v8 }
  0x87   :  { %3427 = vmatmul.mubr.msk.f32.gmra.mrb[60].mxu0 %vm46_vm1, %v180_v9 }
  0x88   :  { %3429 = vmatprep.mubr.msk.f32.mxu0 %vm46_vm1, %v181_v10 }
  0x89   :  { %3526 = vmatmul.mubr.msk.f32.gmra.mrb[62].mxu1 %vm46_vm1, %v246_v11 }
  0x8a   :  { %3528 = vmatprep.mubr.msk.f32.mxu1 %vm46_vm1, %v247_v12 }
  0x8b   :  { %3430 = vmatmul.mubr.msk.f32.gmra.mrb[62].mxu0 %vm46_vm1, %v182_v13  ;;  %v4511_v13 = vld [vmem:[%s5727_s7] ss:$0 sm:$0xff] }
  0x8d   :  { %3529 = vmatmul.mubr.msk.f32.gmra.mrb[64].mxu1 %vm46_vm1, %v248_v14 }
  0xde   :  { %v116_v19 = vpop.f32.mrb[0].mxu0 }
  0xdf   :  { %v117_v20 = vadd.f32 %v3051_v15, %v116_v19  ;;  %v3330_v21 = vpop.f32.mrb[1].mxu0 }
  0xe0   :  { %v4434_v22 = vpop.f32.mrb[0].mxu1 }
  0xe1   :  { %120 = vst.msk [vmem:[#allocation2] sm:$0xff] %vm46_vm1, %v117_v20  ;;  %v4440_v25 = vpop.f32.mrb[1].mxu1 }
  0xe4   :  { %v3437_v26 = vpop.f32.mrb[2].mxu1 }
  0xe5   :  { %v1024_v28 = vpop.f32.mrb[3].mxu1 }
  0xe6   :  { %v3341_v29 = vpop.f32.mrb[2].mxu0 }
  0xe7   :  { %v704_v30 = vpop.f32.mrb[3].mxu0 }
  0xe8   :  { %v1343_v31 = vld [vmem:[#allocation2] sm:$0xff]  ;;  %v3440_v32 = vpop.f32.mrb[4].mxu1 }
  0xe9   :  { %v1345_v33 = vcombine.high %v1343_v31, %v1343_v31  ;;  %v1352_v34 = vrot.slane %v1343_v31, %v4443_v27  ;;  %v4446_v35 = vpop.f32.mrb[5].mxu1 }
  0xea   :  { %v3344_v37 = vpop.f32.mrb[4].mxu0 }
  0xeb   :  { %v1359_v38 = vrot.slane %v1345_v33, %v4443_v27  ;;  %v1368_v39 = vrot.slane %v1352_v34, %v4443_v27  ;;  %v714_v40 = vpop.f32.mrb[5].mxu0  ;;  %v1360_v9 = vcombine.high %v1352_v34, %v1352_v34 }
  0xec   :  { %v4453_v41 = vpop.f32.mrb[6].mxu1 }
  0xed   :  { %v1361_v42 = vcombine.high %v1359_v38, %v1359_v38  ;;  %v1375_v43 = vrot.slane %v1359_v38, %v4443_v27  ;;  %v1390_v44 = vcombine.high %v1368_v39, %v1368_v39  ;;  %v4456_v45 = vpop.f32.mrb[7].mxu1  ;;  %v4459_v46 = vrot.slane %v1368_v39, %v4449_v36 }
  0xee   :  { %v3347_v47 = vpop.f32.mrb[6].mxu0 }
  0xef   :  { %v4462_v48 = vrot.slane %v1361_v42, %v4443_v27  ;;  %v1391_v49 = vcombine.high %v1375_v43, %v1375_v43  ;;  %v724_v50 = vpop.f32.mrb[7].mxu0  ;;  %v4465_v51 = vrot.slane %v1390_v44, %v4449_v36  ;;  %v1435_v52 = vadd.f32 %v3341_v29, %v4459_v46 }
  0xf0   :  { %v1434_v53 = vadd.f32 %v4459_v46, %v704_v30  ;;  %v4469_v54 = vpop.f32.mrb[8].mxu1  ;;  %v1436_v62 = vadd.f32 %v4459_v46, %v714_v40  ;;  %v4491_v0 = vrot.slane %v1375_v43, %v4449_v36  ;;  %v1437_v2 = vadd.f32 %v3344_v37, %v4459_v46 }
  0xf1   :  { %v1393_v55 = vcombine.high %v4462_v48, %v4462_v48  ;;  %v4474_v56 = vrot.slane %v1391_v49, %v4449_v36  ;;  %v4476_v57 = vpop.f32.mrb[9].mxu1  ;;  %3555 = vtanh.f32 %v1435_v52  ;;  %v1439_v5 = vadd.f32 %v3347_v47, %v4459_v46 }
  0xf2   :  { %v4478_v58 = vpop.f32.mrb[8].mxu0  ;;  %3557 = vtanh.f32 %v1434_v53  ;;  %v1499_v7 = vadd.f32 %v3437_v26, %v4491_v0  ;;  %v1438_v10 = vadd.f32 %v4459_v46, %v724_v50  ;;  %v1498_v19 = vadd.f32 %v4491_v0, %v1024_v28 }
  0xf3   :  { %v4481_v59 = vrot.slane %v1393_v55, %v4449_v36  ;;  %v4483_v60 = vpop.f32.mrb[9].mxu0  ;;  %3559 = vtanh.f32 %v1436_v62  ;;  %v4523_v26 = vrot.slane %v1360_v9, %v4443_v27  ;;  %v1501_v29 = vadd.f32 %v3440_v32, %v4491_v0 }
  0xf4   :  { %v4485_v61 = vpop.f32.mrb[10].mxu1  ;;  %3561 = vtanh.f32 %v1437_v2  ;;  %v1500_v27 = vadd.f32 %v4491_v0, %v4446_v35  ;;  %v1502_v42 = vadd.f32 %v4491_v0, %v4456_v45  ;;  %v1503_v53 = vadd.f32 %v4453_v41, %v4491_v0 }
  0xf5   :  { %v4488_v63 = vpop.f32.mrb[11].mxu1  ;;  %3563 = vtanh.f32 %v1439_v5  ;;  %v1392_v40 = vcombine.high %v4523_v26, %v4523_v26  ;;  %v1441_v5 = vadd.f32 %v4478_v58, %v4459_v46  ;;  %v4569_v9 = vrot.slane %v4462_v48, %v4449_v36 }
  0xf6   :  { %v4493_v1 = vpop.f32.mrb[10].mxu0  ;;  %3565 = vtanh.f32 %v1499_v7  ;;  %v1504_v58 = vadd.f32 %v4491_v0, %v4476_v57 }
  0xf7   :  { %v4496_v3 = vpop.f32.mrb[11].mxu0  ;;  %3567 = vtanh.f32 %v1438_v10  ;;  %v4561_v2 = vrot.slane %v1392_v40, %v4449_v36  ;;  %v1505_v40 = vadd.f32 %v4469_v54, %v4491_v0 }
  0xf8   :  { %v4498_v4 = vpop.f32.mrb[12].mxu1  ;;  %3569 = vtanh.f32 %v1498_v19 }
  0xf9   :  { %v4501_v6 = vpop.f32.mrb[13].mxu1  ;;  %3571 = vtanh.f32 %v1501_v29  ;;  %5735 = vst [vmem:[#allocation7_spill] sm:$0xff] %v4561_v2 }
  0xfa   :  { %v3356_v8 = vpop.f32.mrb[12].mxu0  ;;  %3573 = vtanh.f32 %v1500_v27 }
  0xfb   :  { %v4506_v11 = vadd.f32 %v3356_v8, %v4459_v46  ;;  %v754_v12 = vpop.f32.mrb[13].mxu0  ;;  %v3556_v14 = vpop.eup %3555  ;;  %3575 = vtanh.f32 %v1502_v42 }
  0xfc   :  { %v4514_v15 = vadd.f32 %v4459_v46, %v754_v12  ;;  %v4516_v16 = vpop.f32.mrb[14].mxu1  ;;  %v3558_v17 = vpop.eup %3557  ;;  %v1698_v37 = vmul.f32 %v3556_v14, %v4511_v13  ;;  %3577 = vtanh.f32 %v1503_v53 }
  0xfd   :  { %v4519_v20 = vpop.f32.mrb[15].mxu1  ;;  %v1697_v23 = vmul.f32 %v3558_v17, %v4511_v13  ;;  %v3560_v39 = vpop.eup %3559  ;;  %3579 = vtanh.f32 %v1441_v5 }
  0xfe   :  { %v3359_v21 = vpop.f32.mrb[14].mxu0  ;;  %v1828_v35 = vsel %vm46_vm1, %v1698_v37, 0.0  ;;  %v1699_v50 = vmul.f32 %v3560_v39, %v4511_v13  ;;  %v3562_v52 = vpop.eup %3561  ;;  %3581 = vtanh.f32 %v1504_v58 }
  0xff   :  { %v4527_v30 = vadd.f32 %v3359_v21, %v4459_v46  ;;  %v764_v31 = vpop.f32.mrb[15].mxu0  ;;  %v1825_v28 = vsel %vm46_vm1, %v1697_v23, 0.0  ;;  %v3564_v62 = vpop.eup %3563  ;;  %v1700_v14 = vmul.f32 %v3562_v52, %v4511_v13  ;;  %v1440_v52 = vadd.f32 %v4459_v46, %v4483_v60 }
 0x100   :  { %v4529_v33 = vpop.f32.mrb[16].mxu1  ;;  %v4533_v34 = vadd.f32 %v4459_v46, %v764_v31  ;;  %1826 = vadd.xlane.f32.xlu0 %v1825_v28  ;;  %v3566_v8 = vpop.eup %3565  ;;  %v1702_v41 = vmul.f32 %v3564_v62, %v4511_v13  ;;  %v1831_v12 = vsel %vm46_vm1, %v1699_v50, 0.0  ;;  %v1496_v28 = vadd.f32 %v4561_v2, %v4440_v25 }
 0x101   :  { %v4538_v32 = vpop.f32.mrb[17].mxu1  ;;  %v3568_v17 = vpop.eup %3567  ;;  %v1834_v27 = vsel %vm46_vm1, %v1700_v14, 0.0 }
 0x102   :  { %v3362_v38 = vpop.f32.mrb[16].mxu0  ;;  %v1840_v21 = vsel %vm46_vm1, %v1702_v41, 0.0  ;;  %v1701_v48 = vmul.f32 %v3568_v17, %v4511_v13  ;;  %v3570_v31 = vpop.eup %3569  ;;  %3583 = vtanh.f32 %v1496_v28  ;;  %v4611_v41 = vrot.slane %v4523_v26, %v4449_v36 }
 0x103   :  { %v4545_v43 = vadd.f32 %v3362_v38, %v4459_v46  ;;  %v774_v44 = vpop.f32.mrb[17].mxu0  ;;  %1841 = vadd.xlane.f32.xlu1 %v1840_v21  ;;  %v1762_v38 = vmul.f32 %v3566_v8, %v4511_v13  ;;  %v3572_v39 = vpop.eup %3571  ;;  %3585 = vtanh.f32 %v1505_v40  ;;  %v1513_v21 = vadd.f32 %v4529_v33, %v4491_v0 }
 0x104   :  { %v4547_v47 = vpop.f32.mrb[18].mxu1  ;;  %v4551_v49 = vadd.f32 %v4459_v46, %v774_v44  ;;  %1829 = vadd.xlane.f32.xlu0 %v1828_v35  ;;  %v1837_v25 = vsel %vm46_vm1, %v1701_v48, 0.0  ;;  %v1761_v44 = vmul.f32 %v3570_v31, %v4511_v13  ;;  %v3574_v50 = vpop.eup %3573  ;;  %v1764_v5 = vmul.f32 %v3572_v39, %v4511_v13 }
 0x105   :  { %v4556_v45 = vpop.f32.mrb[19].mxu1  ;;  %v2020_v54 = vsel %vm46_vm1, %v1762_v38, 0.0  ;;  %v3576_v8 = vpop.eup %3575  ;;  %v1763_v17 = vmul.f32 %v3574_v50, %v4511_v13  ;;  %3587 = vtanh.f32 %v1440_v52  ;;  %v1507_v38 = vadd.f32 %v4485_v61, %v4491_v0 }
 0x106   :  { %v4558_v55 = vpop.f32.mrb[18].mxu0  ;;  %v2017_v14 = vsel %vm46_vm1, %v1761_v44, 0.0  ;;  %v2026_v48 = vsel %vm46_vm1, %v1764_v5, 0.0  ;;  %v1765_v28 = vmul.f32 %v3576_v8, %v4511_v13  ;;  %v1512_v50 = vadd.f32 %v4491_v0, %v4538_v32 }
 0x107   :  { %v4565_v7 = vpop.f32.mrb[19].mxu0  ;;  %1838 = vadd.xlane.f32.xlu1 %v1837_v25  ;;  %v2023_v39 = vsel %vm46_vm1, %v1763_v17, 0.0 }
 0x108   :  { %v4572_v10 = vpop.f32.mrb[20].mxu1  ;;  %1832 = vadd.xlane.f32.xlu0 %v1831_v12  ;;  %v1497_v12 = vadd.f32 %v4434_v22, %v4561_v2  ;;  %v2029_v61 = vsel %vm46_vm1, %v1765_v28, 0.0 }
 0x109   :  { %v1114_v19 = vpop.f32.mrb[21].mxu1 }
 0x10a   :  { %v4581_v23 = vadd.f32 %v4569_v9, %v1114_v19  ;;  %v4583_v29 = vpop.f32.mrb[20].mxu0  ;;  %v3578_v19 = vpop.eup %3577  ;;  %3589 = vtanh.f32 %v1497_v12  ;;  %v1506_v12 = vadd.f32 %v4491_v0, %v4488_v63 }
 0x10b   :  { %v4587_v37 = vpop.f32.mrb[21].mxu0  ;;  %2018 = vadd.xlane.f32.xlu1 %v2017_v14  ;;  %v1766_v40 = vmul.f32 %v3578_v19, %v4511_v13  ;;  %3591 = vtanh.f32 %v1513_v21  ;;  %v1514_v21 = vadd.f32 %v4569_v9, %v4556_v45 }
 0x10c   :  { %v4589_v57 = vpop.f32.mrb[22].mxu1  ;;  %1835 = vadd.xlane.f32.xlu0 %v1834_v27  ;;  %v3580_v27 = vpop.eup %3579  ;;  %3593 = vtanh.f32 %v1507_v38  ;;  %v1443_v38 = vadd.f32 %v4493_v1, %v4459_v46 }
 0x10d   :  { %v4595_v42 = vpop.f32.mrb[23].mxu1  ;;  %v3582_v44 = vpop.eup %3581  ;;  %v1704_v5 = vmul.f32 %v3580_v27, %v4511_v13  ;;  %v2032_v17 = vsel %vm46_vm1, %v1766_v40, 0.0  ;;  %3595 = vtanh.f32 %v1512_v50 }
 0x10e   :  { %v4599_v35 = vpop.f32.mrb[22].mxu0  ;;  %v3584_v8 = vpop.eup %3583  ;;  %v1767_v32 = vmul.f32 %v3582_v44, %v4511_v13  ;;  %3597 = vtanh.f32 %v1506_v12 }
 0x10f   :  { %v4603_v53 = vpop.f32.mrb[23].mxu0  ;;  %2024 = vadd.xlane.f32.xlu1 %v2023_v39  ;;  %v3586_v19 = vpop.eup %3585  ;;  %v1846_v63 = vsel %vm46_vm1, %v1704_v5, 0.0  ;;  %v1759_v28 = vmul.f32 %v3584_v8, %v4511_v13  ;;  %3599 = vtanh.f32 %v1514_v21  ;;  %v1519_v5 = vadd.f32 %v4589_v57, %v4569_v9 }
 0x110   :  { %v4605_v62 = vpop.f32.mrb[24].mxu1  ;;  %2021 = vadd.xlane.f32.xlu0 %v2020_v54  ;;  %v3588_v27 = vpop.eup %3587  ;;  %v2035_v45 = vsel %vm46_vm1, %v1767_v32, 0.0  ;;  %v1768_v44 = vmul.f32 %v3586_v19, %v4511_v13  ;;  %3601 = vtanh.f32 %v1443_v38  ;;  %v1442_v32 = vadd.f32 %v4459_v46, %v4496_v3 }
 0x111   :  { %v4615_v60 = vpop.f32.mrb[25].mxu1  ;;  %v2011_v12 = vsel %vm46_vm1, %v1759_v28, 0.0  ;;  %3603 = vtanh.f32 %v1519_v5  ;;  %v1509_v5 = vadd.f32 %v4498_v4, %v4491_v0 }
 0x112   :  { %v3374_v58 = vpop.f32.mrb[24].mxu0  ;;  %v2038_v57 = vsel %vm46_vm1, %v1768_v44, 0.0  ;;  %3605 = vtanh.f32 %v1442_v32 }
 0x113   :  { %v4622_v36 = vadd.f32 %v3374_v58, %v4611_v41  ;;  %v814_v26 = vpop.f32.mrb[25].mxu0  ;;  %2033 = vadd.xlane.f32.xlu1 %v2032_v17  ;;  %v1703_v17 = vmul.f32 %v3588_v27, %v4511_v13  ;;  %v1518_v27 = vadd.f32 %v4569_v9, %v4595_v42 }
 0x114   :  { %v4624_v22 = vpop.f32.mrb[26].mxu1  ;;  %v4628_v31 = vadd.f32 %v4611_v41, %v814_v26  ;;  %2027 = vadd.xlane.f32.xlu0 %v2026_v48 }
 0x115   :  { %v4633_v33 = vpop.f32.mrb[27].mxu1  ;;  %3607 = vtanh.f32 %v1518_v27  ;;  %v1508_v27 = vadd.f32 %v4491_v0, %v4501_v6 }
 0x116   :  { %v4637_v25 = vpop.f32.mrb[26].mxu0  ;;  %3609 = vtanh.f32 %v1509_v5 }
 0x117   :  { %v4641_v52 = vpop.f32.mrb[27].mxu0  ;;  %2036 = vadd.xlane.f32.xlu1 %v2035_v45 }
 0x118   :  { %v4643_v54 = vpop.f32.mrb[28].mxu1  ;;  %2030 = vadd.xlane.f32.xlu0 %v2029_v61  ;;  %v3590_v61 = vpop.eup %3589 }
 0x119   :  { %v4649_v14 = vpop.f32.mrb[29].mxu1 }
 0x11a   :  { %v4653_v58 = vpop.f32.mrb[28].mxu0 }
 0x11b   :  { %v4657_v26 = vpop.f32.mrb[29].mxu0  ;;  %2039 = vadd.xlane.f32.xlu1 %v2038_v57 }
 0x11c   :  { %v3479_v48 = vpop.f32.mrb[30].mxu1  ;;  %1847 = vadd.xlane.f32.xlu0 %v1846_v63  ;;  %v1760_v63 = vmul.f32 %v3590_v61, %v4511_v13 }
 0x11d   :  { %v4664_v39 = vadd.f32 %v3479_v48, %v4569_v9  ;;  %v4666_v40 = vpop.f32.mrb[31].mxu1  ;;  %v3592_v48 = vpop.eup %3591 }
 0x11e   :  { %v4670_v50 = vpop.f32.mrb[30].mxu0  ;;  %v3594_v18 = vpop.eup %3593  ;;  %v1776_v61 = vmul.f32 %v3592_v48, %v4511_v13  ;;  %v2014_v57 = vsel %vm46_vm1, %v1760_v63, 0.0  ;;  %v1455_v48 = vadd.f32 %v4599_v35, %v4611_v41 }
 0x11f   :  { %v4674_v8 = vpop.f32.mrb[31].mxu0  ;;  %2015 = vadd.xlane.f32.xlu1 %v2014_v57 }
 0x120   :  { %v3482_v1 = vpop.f32.mrb[32].mxu1  ;;  %2012 = vadd.xlane.f32.xlu0 %v2011_v12  ;;  %v3596_v12 = vpop.eup %3595  ;;  %3611 = vtanh.f32 %v1455_v48 }
 0x121   :  { %v4681_v19 = vadd.f32 %v3482_v1, %v4569_v9  ;;  %v1174_v21 = vpop.f32.mrb[33].mxu1  ;;  %v1843_v1 = vsel %vm46_vm1, %v1703_v17, 0.0  ;;  %v3598_v2 = vpop.eup %3597  ;;  %3613 = vtanh.f32 %v1508_v27 }
 0x122   :  { %v4686_v45 = vadd.f32 %v4569_v9, %v1174_v21  ;;  %v3386_v28 = vpop.f32.mrb[32].mxu0  ;;  %v1769_v24 = vmul.f32 %v3598_v2, %v4511_v13 }
 0x123   :  { %v4691_v46 = vadd.f32 %v3386_v28, %v4611_v41  ;;  %v854_v3 = vpop.f32.mrb[33].mxu0  ;;  %v1770_v28 = vmul.f32 %v3594_v18, %v4511_v13  ;;  %v1775_v18 = vmul.f32 %v3596_v12, %v4511_v13  ;;  %v1454_v12 = vadd.f32 %v4611_v41, %v4603_v53 }
 0x124   :  { %v3485_v38 = vpop.f32.mrb[34].mxu1  ;;  %v4695_v44 = vadd.f32 %v4611_v41, %v854_v3  ;;  %1844 = vadd.xlane.f32.xlu0 %v1843_v1  ;;  %v2062_v1 = vsel %vm46_vm1, %v1776_v61, 0.0 }
 0x125   :  { %v4701_v42 = vadd.f32 %v3485_v38, %v4474_v56  ;;  %v1184_v21 = vpop.f32.mrb[35].mxu1  ;;  %3615 = vtanh.f32 %v1454_v12 }
 0x126   :  { %v4706_v17 = vadd.f32 %v4474_v56, %v1184_v21  ;;  %v3389_v3 = vpop.f32.mrb[34].mxu0  ;;  %v3600_v21 = vpop.eup %3599  ;;  %3617 = vtanh.f32 %v4506_v11 }
 0x127   :  { %v4711_v4 = vadd.f32 %v3389_v3, %v4465_v51  ;;  %v864_v32 = vpop.f32.mrb[35].mxu0  ;;  %v2044_v3 = vsel %vm46_vm1, %v1770_v28, 0.0  ;;  %v1777_v2 = vmul.f32 %v3600_v21, %v4511_v13 }
 0x128   :  { %v3488_v38 = vpop.f32.mrb[36].mxu1  ;;  %v4715_v63 = vadd.f32 %v4465_v51, %v864_v32  ;;  %2063 = vadd.xlane.f32.xlu0 %v2062_v1  ;;  %2045 = vadd.xlane.f32.xlu1 %v2044_v3  ;;  %v2059_v1 = vsel %vm46_vm1, %v1775_v18, 0.0  ;;  %v2041_v3 = vsel %vm46_vm1, %v1769_v24, 0.0 }
 0x129   :  { %5736 = vst [vmem:[#allocation8_spill] sm:$0xff] %v4711_v4  ;;  %v4721_v35 = vadd.f32 %v3488_v38, %v4474_v56  ;;  %v1194_v57 = vpop.f32.mrb[37].mxu1  ;;  %v3602_v4 = vpop.eup %3601 }
 0x12a   :  { %v4726_v61 = vadd.f32 %v4474_v56, %v1194_v57  ;;  %v3392_v32 = vpop.f32.mrb[36].mxu0  ;;  %v3604_v57 = vpop.eup %3603 }
 0x12b   :  { %5737 = vst [vmem:[#allocation9_spill] sm:$0xff] %v4721_v35  ;;  %v4731_v6 = vadd.f32 %v3392_v32, %v4465_v51  ;;  %v874_v5 = vpop.f32.mrb[37].mxu0  ;;  %v1706_v32 = vmul.f32 %v3602_v4, %v4511_v13  ;;  %v3606_v35 = vpop.eup %3605  ;;  %v1782_v4 = vmul.f32 %v3604_v57, %v4511_v13  ;;  %v1520_v57 = vadd.f32 %v4569_v9, %v4615_v60 }
 0x12c   :  { %v3491_v38 = vpop.f32.mrb[38].mxu1  ;;  %v4735_v28 = vadd.f32 %v4465_v51, %v874_v5  ;;  %2060 = vadd.xlane.f32.xlu0 %v2059_v1  ;;  %v1521_v5 = vadd.f32 %v4605_v62, %v4569_v9  ;;  %2042 = vadd.xlane.f32.xlu1 %v2041_v3  ;;  %v2065_v1 = vsel %vm46_vm1, %v1777_v2, 0.0  ;;  %v1705_v3 = vmul.f32 %v3606_v35, %v4511_v13 }
 0x12d   :  { %5738 = vst [vmem:[#allocation10_spill] sm:$0xff] %v4731_v6  ;;  %v4739_v48 = vadd.f32 %v3491_v38, %v4474_v56  ;;  %v1204_v53 = vpop.f32.mrb[39].mxu1  ;;  %v1852_v12 = vsel %vm46_vm1, %v1706_v32, 0.0 }
 0x12e   :  { %v4744_v6 = vadd.f32 %v4474_v56, %v1204_v53  ;;  %v3395_v18 = vpop.f32.mrb[38].mxu0  ;;  %v3608_v53 = vpop.eup %3607  ;;  %3619 = vtanh.f32 %v1521_v5  ;;  %v1511_v5 = vadd.f32 %v4516_v16, %v4491_v0 }
 0x12f   :  { %v4749_v21 = vadd.f32 %v3395_v18, %v4465_v51  ;;  %v884_v27 = vpop.f32.mrb[39].mxu0  ;;  %v1781_v35 = vmul.f32 %v3608_v53, %v4511_v13  ;;  %3621 = vtanh.f32 %v4514_v15  ;;  %v1523_v15 = vadd.f32 %v4624_v22, %v4569_v9 }
 0x130   :  { %5739 = vst [vmem:[#allocation11_spill] sm:$0xff] %v4744_v6  ;;  %v3494_v38 = vpop.f32.mrb[40].mxu1  ;;  %v4753_v24 = vadd.f32 %v4465_v51, %v884_v27  ;;  %2066 = vadd.xlane.f32.xlu0 %v2065_v1  ;;  %v3610_v27 = vpop.eup %3609  ;;  %1853 = vadd.xlane.f32.xlu1 %v1852_v12  ;;  %3623 = vtanh.f32 %v1520_v57  ;;  %v1510_v57 = vadd.f32 %v4491_v0, %v4519_v20 }
 0x131   :  { %v4758_v6 = vadd.f32 %v3494_v38, %v4474_v56  ;;  %v1214_v62 = vpop.f32.mrb[41].mxu1  ;;  %3625 = vtanh.f32 %v1511_v5 }
 0x132   :  { %v4763_v18 = vadd.f32 %v4474_v56, %v1214_v62  ;;  %v3398_v2 = vpop.f32.mrb[40].mxu0  ;;  %v3612_v62 = vpop.eup %3611  ;;  %3627 = vtanh.f32 %v1523_v15 }
 0x133   :  { %5740 = vst [vmem:[#allocation12_spill] sm:$0xff] %v4758_v6  ;;  %v4768_v11 = vadd.f32 %v3398_v2, %v4465_v51  ;;  %v894_v38 = vpop.f32.mrb[41].mxu0  ;;  %v2080_v6 = vsel %vm46_vm1, %v1782_v4, 0.0  ;;  %v1849_v2 = vsel %vm46_vm1, %v1705_v3, 0.0  ;;  %v1772_v4 = vmul.f32 %v3610_v27, %v4511_v13  ;;  %v3614_v53 = vpop.eup %3613 }
 0x134   :  { %v3497_v1 = vpop.f32.mrb[42].mxu1  ;;  %v4772_v32 = vadd.f32 %v4465_v51, %v894_v38  ;;  %2081 = vadd.xlane.f32.xlu0 %v2080_v6  ;;  %1850 = vadd.xlane.f32.xlu1 %v1849_v2  ;;  %v1718_v27 = vmul.f32 %v3612_v62, %v4511_v13  ;;  %v1522_v62 = vadd.f32 %v4569_v9, %v4633_v33  ;;  %3629 = vtanh.f32 %v1510_v57 }
 0x135   :  { %5741 = vst [vmem:[#allocation13_spill] sm:$0xff] %v4768_v11  ;;  %v4779_v60 = vadd.f32 %v3497_v1, %v4474_v56  ;;  %v1224_v12 = vpop.f32.mrb[43].mxu1  ;;  %v2050_v2 = vsel %vm46_vm1, %v1772_v4, 0.0 }
 0x136   :  { %v4784_v38 = vadd.f32 %v4474_v56, %v1224_v12  ;;  %v3401_v11 = vpop.f32.mrb[42].mxu0  ;;  %v3616_v12 = vpop.eup %3615  ;;  %3631 = vtanh.f32 %v1522_v62 }
 0x137   :  { %5742 = vst [vmem:[#allocation14_spill] sm:$0xff] %v4779_v60  ;;  %v4789_v16 = vadd.f32 %v3401_v11, %v4465_v51  ;;  %v904_v1 = vpop.f32.mrb[43].mxu0  ;;  %v2077_v60 = vsel %vm46_vm1, %v1781_v35, 0.0  ;;  %3633 = vtanh.f32 %v4527_v30 }
 0x138   :  { %v3500_v6 = vpop.f32.mrb[44].mxu1  ;;  %v4793_v3 = vadd.f32 %v4465_v51, %v904_v1  ;;  %2078 = vadd.xlane.f32.xlu0 %v2077_v60  ;;  %2051 = vadd.xlane.f32.xlu1 %v2050_v2  ;;  %v1888_v60 = vsel %vm46_vm1, %v1718_v27, 0.0 }
 0x139   :  { %5743 = vst [vmem:[#allocation15_spill] sm:$0xff] %v4789_v16  ;;  %v4799_v22 = vadd.f32 %v3500_v6, %v4474_v56  ;;  %v1234_v11 = vpop.f32.mrb[45].mxu1  ;;  %v1771_v16 = vmul.f32 %v3614_v53, %v4511_v13  ;;  %v1717_v53 = vmul.f32 %v3616_v12, %v4511_v13  ;;  %v1459_v12 = vadd.f32 %v4637_v25, %v4611_v41 }
 0x13a   :  { %5744 = vst [vmem:[#allocation16_spill] sm:$0xff] %v4793_v3  ;;  %v4804_v35 = vadd.f32 %v4474_v56, %v1234_v11  ;;  %v3404_v1 = vpop.f32.mrb[44].mxu0  ;;  %v3618_v3 = vpop.eup %3617 }
 0x13b   :  { %v4809_v0 = vadd.f32 %v3404_v1, %v4465_v51  ;;  %v914_v20 = vpop.f32.mrb[45].mxu0  ;;  %v3620_v6 = vpop.eup %3619  ;;  %v2047_v11 = vsel %vm46_vm1, %v1771_v16, 0.0  ;;  %v1708_v2 = vmul.f32 %v3618_v3, %v4511_v13  ;;  %3635 = vtanh.f32 %v1459_v12 }
 0x13c   :  { %v3503_v5 = vpop.f32.mrb[46].mxu1  ;;  %v4813_v4 = vadd.f32 %v4465_v51, %v914_v20  ;;  %1889 = vadd.xlane.f32.xlu0 %v1888_v60  ;;  %2048 = vadd.xlane.f32.xlu1 %v2047_v11  ;;  %v1885_v60 = vsel %vm46_vm1, %v1717_v53, 0.0  ;;  %v1784_v3 = vmul.f32 %v3620_v6, %v4511_v13  ;;  %v1458_v6 = vadd.f32 %v4611_v41, %v4641_v52 }
 0x13d   :  { %5745 = vst [vmem:[#allocation17_spill] sm:$0xff] %v4809_v0  ;;  %v4817_v15 = vadd.f32 %v3503_v5, %v4474_v56  ;;  %v1244_v33 = vpop.f32.mrb[47].mxu1  ;;  %v3622_v0 = vpop.eup %3621  ;;  %v1858_v11 = vsel %vm46_vm1, %v1708_v2, 0.0  ;;  %3637 = vtanh.f32 %v4533_v34 }
 0x13e   :  { %v4822_v1 = vadd.f32 %v4474_v56, %v1244_v33  ;;  %v3407_v27 = vpop.f32.mrb[46].mxu0  ;;  %v3624_v33 = vpop.eup %3623  ;;  %3639 = vtanh.f32 %v1458_v6 }
 0x13f   :  { %v4827_v57 = vadd.f32 %v3407_v27, %v4465_v51  ;;  %v924_v20 = vpop.f32.mrb[47].mxu0  ;;  %v1707_v27 = vmul.f32 %v3622_v0, %v4511_v13  ;;  %3641 = vtanh.f32 %v4545_v43  ;;  %v1524_v43 = vadd.f32 %v4569_v9, %v4649_v14 }
 0x140   :  { %v3506_v5 = vpop.f32.mrb[48].mxu1  ;;  %v4831_v16 = vadd.f32 %v4465_v51, %v924_v20  ;;  %1886 = vadd.xlane.f32.xlu0 %v1885_v60  ;;  %v3626_v20 = vpop.eup %3625  ;;  %1859 = vadd.xlane.f32.xlu1 %v1858_v11 }
 0x141   :  { %5746 = vst [vmem:[#allocation18_spill] sm:$0xff] %v4827_v57  ;;  %v4836_v62 = vadd.f32 %v3506_v5, %v4474_v56  ;;  %v1254_v25 = vpop.f32.mrb[49].mxu1  ;;  %v3628_v0 = vpop.eup %3627  ;;  %v1774_v11 = vmul.f32 %v3626_v20, %v4511_v13  ;;  %v1515_v20 = vadd.f32 %v4547_v47, %v4569_v9 }
 0x142   :  { %5747 = vst [vmem:[#allocation19_spill] sm:$0xff] %v4831_v16  ;;  %v4841_v57 = vadd.f32 %v4474_v56, %v1254_v25  ;;  %v3410_v53 = vpop.f32.mrb[48].mxu0  ;;  %v1783_v56 = vmul.f32 %v3624_v33, %v4511_v13  ;;  %v1855_v25 = vsel %vm46_vm1, %v1707_v27, 0.0  ;;  %v1525_v33 = vadd.f32 %v4643_v54, %v4569_v9 }
 0x143   :  { %5748 = vst [vmem:[#allocation20_spill] sm:$0xff] %v4836_v62  ;;  %v4846_v30 = vadd.f32 %v3410_v53, %v4465_v51  ;;  %v934_v5 = vpop.f32.mrb[49].mxu0  ;;  %v2086_v62 = vsel %vm46_vm1, %v1784_v3, 0.0  ;;  %v1786_v27 = vmul.f32 %v3628_v0, %v4511_v13  ;;  %v2056_v6 = vsel %vm46_vm1, %v1774_v11, 0.0 }
 0x144   :  { %5749 = vst [vmem:[#allocation21_spill] sm:$0xff] %v4841_v57  ;;  %v3509_v60 = vpop.f32.mrb[50].mxu1  ;;  %v4850_v2 = vadd.f32 %v4465_v51, %v934_v5  ;;  %2087 = vadd.xlane.f32.xlu0 %v2086_v62  ;;  %v3630_v51 = vpop.eup %3629  ;;  %1856 = vadd.xlane.f32.xlu1 %v1855_v25  ;;  %v2083_v62 = vsel %vm46_vm1, %v1783_v56, 0.0  ;;  %3643 = vtanh.f32 %v1525_v33 }
 0x145   :  { %5750 = vst [vmem:[#allocation22_spill] sm:$0xff] %v4846_v30  ;;  %v4855_v12 = vadd.f32 %v3509_v60, %v4481_v59  ;;  %v1264_v52 = vpop.f32.mrb[51].mxu1  ;;  %v3632_v60 = vpop.eup %3631  ;;  %v1773_v25 = vmul.f32 %v3630_v51, %v4511_v13  ;;  %3645 = vtanh.f32 %v1515_v20 }
 0x146   :  { %5751 = vst [vmem:[#allocation23_spill] sm:$0xff] %v4850_v2  ;;  %v4860_v53 = vadd.f32 %v4481_v59, %v1264_v52  ;;  %v4862_v3 = vpop.f32.mrb[50].mxu0  ;;  %v3634_v0 = vpop.eup %3633  ;;  %v1785_v11 = vmul.f32 %v3632_v60, %v4511_v13  ;;  %3647 = vtanh.f32 %v1524_v43 }
 0x147   :  { %v4866_v34 = vpop.f32.mrb[51].mxu0  ;;  %v2053_v33 = vsel %vm46_vm1, %v1773_v25, 0.0  ;;  %v1710_v2 = vmul.f32 %v3634_v0, %v4511_v13  ;;  %3649 = vtanh.f32 %v4551_v49  ;;  %v1451_v0 = vadd.f32 %v4558_v55, %v4611_v41 }
 0x148   :  { %5752 = vst [vmem:[#allocation24_spill] sm:$0xff] %v4860_v53  ;;  %5753 = vst [vmem:[#allocation25_spill] sm:$0xff] %v4866_v34  ;;  %v3512_v5 = vpop.f32.mrb[52].mxu1  ;;  %2084 = vadd.xlane.f32.xlu0 %v2083_v62  ;;  %2057 = vadd.xlane.f32.xlu1 %v2056_v6  ;;  %v2092_v62 = vsel %vm46_vm1, %v1786_v27, 0.0  ;;  %v3636_v34 = vpop.eup %3635  ;;  %v1461_v27 = vadd.f32 %v4653_v58, %v4611_v41  ;;  %v1460_v49 = vadd.f32 %v4611_v41, %v4657_v26 }
 0x149   :  { %v4874_v52 = vadd.f32 %v3512_v5, %v4481_v59  ;;  %v1274_v54 = vpop.f32.mrb[53].mxu1  ;;  %v3638_v30 = vpop.eup %3637  ;;  %v1722_v25 = vmul.f32 %v3636_v34, %v4511_v13  ;;  %v1864_v58 = vsel %vm46_vm1, %v1710_v2, 0.0 }
 0x14a   :  { %v4879_v53 = vadd.f32 %v4481_v59, %v1274_v54  ;;  %v4881_v56 = vpop.f32.mrb[52].mxu0  ;;  %3651 = vtanh.f32 %v1461_v27 }
 0x14b   :  { %v4885_v47 = vpop.f32.mrb[53].mxu0  ;;  %3653 = vtanh.f32 %v1451_v0  ;;  %v1526_v0 = vadd.f32 %v4569_v9, %v4666_v40 }
 0x14c   :  { %v3515_v5 = vpop.f32.mrb[54].mxu1  ;;  %2093 = vadd.xlane.f32.xlu0 %v2092_v62  ;;  %2054 = vadd.xlane.f32.xlu1 %v2053_v33  ;;  %v3640_v62 = vpop.eup %3639  ;;  %v1709_v33 = vmul.f32 %v3638_v30, %v4511_v13  ;;  %v1450_v30 = vadd.f32 %v4611_v41, %v4565_v7  ;;  %3655 = vtanh.f32 %v1460_v49 }
 0x14d   :  { %v4890_v51 = vadd.f32 %v3515_v5, %v4481_v59  ;;  %v1284_v54 = vpop.f32.mrb[55].mxu1  ;;  %v2089_v5 = vsel %vm46_vm1, %v1785_v11, 0.0  ;;  %v3642_v34 = vpop.eup %3641  ;;  %v1721_v2 = vmul.f32 %v3640_v62, %v4511_v13 }
 0x14e   :  { %v4895_v14 = vadd.f32 %v4481_v59, %v1284_v54  ;;  %v4897_v6 = vpop.f32.mrb[54].mxu0  ;;  %v1861_v26 = vsel %vm46_vm1, %v1709_v33, 0.0  ;;  %3657 = vtanh.f32 %v1450_v30 }
 0x14f   :  { %5754 = vst [vmem:[#allocation26_spill] sm:$0xff] %v4897_v6  ;;  %v4901_v60 = vpop.f32.mrb[55].mxu0  ;;  %v3644_v6 = vpop.eup %3643  ;;  %3659 = vtanh.f32 %v1526_v0 }
 0x150   :  { %5755 = vst [vmem:[#allocation27_spill] sm:$0xff] %v4901_v60  ;;  %v3518_v20 = vpop.f32.mrb[56].mxu1  ;;  %2090 = vadd.xlane.f32.xlu0 %v2089_v5  ;;  %1865 = vadd.xlane.f32.xlu1 %v1864_v58  ;;  %v1900_v5 = vsel %vm46_vm1, %v1722_v25, 0.0  ;;  %v1712_v58 = vmul.f32 %v3642_v34, %v4511_v13  ;;  %v3646_v62 = vpop.eup %3645  ;;  %v1788_v33 = vmul.f32 %v3644_v6, %v4511_v13 }
 0x151   :  { %v4909_v54 = vadd.f32 %v3518_v20, %v4481_v59  ;;  %v1294_v43 = vpop.f32.mrb[57].mxu1  ;;  %v3648_v16 = vpop.eup %3647  ;;  %v1517_v34 = vadd.f32 %v4572_v10, %v4569_v9  ;;  %v1463_v9 = vadd.f32 %v4670_v50, %v4611_v41 }
 0x152   :  { %v4914_v60 = vadd.f32 %v4481_v59, %v1294_v43  ;;  %v4916_v11 = vpop.f32.mrb[56].mxu0  ;;  %v1870_v40 = vsel %vm46_vm1, %v1712_v58, 0.0  ;;  %v3650_v6 = vpop.eup %3649  ;;  %v1787_v58 = vmul.f32 %v3648_v16, %v4511_v13  ;;  %v1462_v16 = vadd.f32 %v4611_v41, %v4674_v8 }
 0x153   :  { %v4920_v55 = vpop.f32.mrb[57].mxu0  ;;  %3661 = vtanh.f32 %v1517_v34 }
 0x154   :  { %v3521_v20 = vpop.f32.mrb[58].mxu1  ;;  %1901 = vadd.xlane.f32.xlu0 %v1900_v5  ;;  %1862 = vadd.xlane.f32.xlu1 %v1861_v26  ;;  %v1897_v5 = vsel %vm46_vm1, %v1721_v2, 0.0  ;;  %v1778_v26 = vmul.f32 %v3646_v62, %v4511_v13  ;;  %3663 = vtanh.f32 %v1463_v9 }
 0x155   :  { %v4927_v43 = vadd.f32 %v3521_v20, %v4481_v59  ;;  %v1304_v27 = vpop.f32.mrb[59].mxu1  ;;  %3665 = vtanh.f32 %v4581_v23 }
 0x156   :  { %v4932_v57 = vadd.f32 %v4481_v59, %v1304_v27  ;;  %v4934_v25 = vpop.f32.mrb[58].mxu0  ;;  %v2068_v0 = vsel %vm46_vm1, %v1778_v26, 0.0  ;;  %3667 = vtanh.f32 %v1462_v16 }
 0x157   :  { %v4938_v7 = vpop.f32.mrb[59].mxu0 }
 0x158   :  { %5756 = vst [vmem:[#allocation28_spill] sm:$0xff] %v4938_v7  ;;  %v3524_v20 = vpop.f32.mrb[60].mxu1  ;;  %1898 = vadd.xlane.f32.xlu0 %v1897_v5  ;;  %1871 = vadd.xlane.f32.xlu1 %v1870_v40  ;;  %v3652_v5 = vpop.eup %3651 }
 0x159   :  { %v4945_v27 = vadd.f32 %v3524_v20, %v4481_v59  ;;  %v1314_v49 = vpop.f32.mrb[61].mxu1  ;;  %v2098_v20 = vsel %vm46_vm1, %v1788_v33, 0.0  ;;  %v1724_v26 = vmul.f32 %v3652_v5, %v4511_v13 }
 0x15a   :  { %v4950_v7 = vadd.f32 %v4481_v59, %v1314_v49  ;;  %v4952_v2 = vpop.f32.mrb[60].mxu0 }
 0x15b   :  { %5757 = vst [vmem:[#allocation29_spill] sm:$0xff] %v4945_v27  ;;  %v4956_v10 = vpop.f32.mrb[61].mxu0  ;;  %v1711_v27 = vmul.f32 %v3650_v6, %v4511_v13  ;;  %v1453_v6 = vadd.f32 %v4583_v29, %v4611_v41  ;;  %v1906_v23 = vsel %vm46_vm1, %v1724_v26, 0.0 }
 0x15c   :  { %5758 = vst [vmem:[#allocation30_spill] sm:$0xff] %v4956_v10  ;;  %v3527_v30 = vpop.f32.mrb[62].mxu1  ;;  %2099 = vadd.xlane.f32.xlu0 %v2098_v20  ;;  %v3654_v10 = vpop.eup %3653  ;;  %2069 = vadd.xlane.f32.xlu1 %v2068_v0 }
 0x15d   :  { %v4961_v62 = vadd.f32 %v3527_v30, %v4481_v59  ;;  %v1324_v49 = vpop.f32.mrb[63].mxu1  ;;  %v2095_v30 = vsel %vm46_vm1, %v1787_v58, 0.0  ;;  %v3656_v20 = vpop.eup %3655  ;;  %v1867_v8 = vsel %vm46_vm1, %v1711_v27, 0.0  ;;  %v1714_v0 = vmul.f32 %v3654_v10, %v4511_v13 }
 0x15e   :  { %v4966_v50 = vadd.f32 %v4481_v59, %v1324_v49  ;;  %v4968_v40 = vpop.f32.mrb[62].mxu0  ;;  %v3658_v58 = vpop.eup %3657  ;;  %v1723_v5 = vmul.f32 %v3656_v20, %v4511_v13  ;;  %3669 = vtanh.f32 %v1453_v6 }
 0x15f   :  { %v4972_v33 = vpop.f32.mrb[63].mxu0  ;;  %v3660_v29 = vpop.eup %3659  ;;  %v1876_v27 = vsel %vm46_vm1, %v1714_v0, 0.0  ;;  %v1713_v10 = vmul.f32 %v3658_v58, %v4511_v13  ;;  %3671 = vtanh.f32 %v4681_v19 }
 0x160   :  { %5759 = vst [vmem:[#allocation31_spill] sm:$0xff] %v4966_v50  ;;  %v3530_v34 = vpop.f32.mrb[64].mxu1  ;;  %2096 = vadd.xlane.f32.xlu0 %v2095_v30  ;;  %1868 = vadd.xlane.f32.xlu1 %v1867_v8  ;;  %v3662_v30 = vpop.eup %3661  ;;  %v1789_v16 = vmul.f32 %v3660_v29, %v4511_v13 }
 0x161   :  { %v4980_v49 = vadd.f32 %v3530_v34, %v4481_v59  ;;  %v1334_v9 = vpop.f32.mrb[65].mxu1  ;;  %v1452_v34 = vadd.f32 %v4611_v41, %v4587_v37  ;;  %v3664_v26 = vpop.eup %3663  ;;  %v1873_v20 = vsel %vm46_vm1, %v1713_v10, 0.0  ;;  %v1780_v37 = vmul.f32 %v3662_v30, %v4511_v13 }
 0x162   :  { %v4985_v50 = vadd.f32 %v4481_v59, %v1334_v9  ;;  %v1903_v59 = vsel %vm46_vm1, %v1723_v5, 0.0  ;;  %v3666_v41 = vpop.eup %3665  ;;  %v2101_v6 = vsel %vm46_vm1, %v1789_v16, 0.0  ;;  %v1726_v19 = vmul.f32 %v3664_v26, %v4511_v13 }
 0x163   :  { %3673 = vtanh.f32 %v1452_v34  ;;  %v3668_v9 = vpop.eup %3667  ;;  %v2074_v8 = vsel %vm46_vm1, %v1780_v37, 0.0  ;;  %v1779_v0 = vmul.f32 %v3666_v41, %v4511_v13 }
 0x164   :  { %1907 = vadd.xlane.f32.xlu0 %v1906_v23  ;;  %1877 = vadd.xlane.f32.xlu1 %v1876_v27  ;;  %3675 = vtanh.f32 %v4691_v46  ;;  %v1912_v23 = vsel %vm46_vm1, %v1726_v19, 0.0  ;;  %v1725_v46 = vmul.f32 %v3668_v9, %v4511_v13 }
 0x165   :  { %3677 = vtanh.f32 %v4622_v36  ;;  %v2071_v29 = vsel %vm46_vm1, %v1779_v0, 0.0 }
 0x166   :  { %3679 = vtanh.f32 %v4695_v44  ;;  %v1909_v27 = vsel %vm46_vm1, %v1725_v46, 0.0 }
 0x167   :  { %3681 = vtanh.f32 %v4628_v31 }
 0x168   :  { %1904 = vadd.xlane.f32.xlu0 %v1903_v59  ;;  %1874 = vadd.xlane.f32.xlu1 %v1873_v20  ;;  %v3670_v58 = vpop.eup %3669  ;;  %3683 = vtanh.f32 %v4706_v17  ;;  %v5021_v17 = vld [vmem:[%s5727_s7] ss:$0 sm:$0xff] }
 0x169   :  { %v3672_v5 = vpop.eup %3671  ;;  %v1716_v36 = vmul.f32 %v3670_v58, %v4511_v13  ;;  %3685 = vtanh.f32 %v4664_v39  ;;  %v5760_v58 = vld [vmem:[#allocation8_spill] sm:$0xff] }
 0x16a   :  { %v1792_v44 = vmul.f32 %v3672_v5, %v4511_v13  ;;  %3687 = vtanh.f32 %v4715_v63  ;;  %v5761_v5 = vld [vmem:[#allocation9_spill] sm:$0xff] }
 0x16b   :  { %v1882_v30 = vsel %vm46_vm1, %v1716_v36, 0.0  ;;  %3689 = vtanh.f32 %v4686_v45 }
 0x16c   :  { %2102 = vadd.xlane.f32.xlu0 %v2101_v6  ;;  %2075 = vadd.xlane.f32.xlu1 %v2074_v8  ;;  %v2110_v16 = vsel %vm46_vm1, %v1792_v44, 0.0  ;;  %3691 = vtanh.f32 %v4726_v61 }
 0x16d   :  { %v3674_v34 = vpop.eup %3673  ;;  %3693 = vtanh.f32 %v4701_v42 }
 0x16e   :  { %v3676_v10 = vpop.eup %3675  ;;  %v1715_v31 = vmul.f32 %v3674_v34, %v4511_v13  ;;  %3695 = vtanh.f32 %v4735_v28 }
 0x16f   :  { %v3678_v59 = vpop.eup %3677  ;;  %v1728_v26 = vmul.f32 %v5021_v17, %v3676_v10  ;;  %3697 = vtanh.f32 %v5760_v58 }
 0x170   :  { %1913 = vadd.xlane.f32.xlu0 %v1912_v23  ;;  %2072 = vadd.xlane.f32.xlu1 %v2071_v29  ;;  %v3680_v20 = vpop.eup %3679  ;;  %v1879_v39 = vsel %vm46_vm1, %v1715_v31, 0.0  ;;  %v1720_v13 = vmul.f32 %v5021_v17, %v3678_v59  ;;  %3699 = vtanh.f32 %v4749_v21  ;;  %v5762_v31 = vld [vmem:[#allocation10_spill] sm:$0xff]  ;;  %v5763_v59 = vlaneseq }
 0x171   :  { %v3682_v37 = vpop.eup %3681  ;;  %v1918_v63 = vsel %vm46_vm1, %v1728_v26, 0.0  ;;  %v1727_v41 = vmul.f32 %v5021_v17, %v3680_v20  ;;  %3701 = vtanh.f32 %v5761_v5 }
 0x172   :  { %v3684_v6 = vpop.eup %3683  ;;  %v1894_v19 = vsel %vm46_vm1, %v1720_v13, 0.0  ;;  %v1719_v45 = vmul.f32 %v5021_v17, %v3682_v37  ;;  %3703 = vtanh.f32 %v4772_v32 }
 0x173   :  { %v3686_v9 = vpop.eup %3685  ;;  %v1915_v8 = vsel %vm46_vm1, %v1727_v41, 0.0  ;;  %v1793_v61 = vmul.f32 %v5021_v17, %v3684_v6  ;;  %3705 = vtanh.f32 %v5762_v31 }
 0x174   :  { %1910 = vadd.xlane.f32.xlu0 %v1909_v27  ;;  %1883 = vadd.xlane.f32.xlu1 %v1882_v30  ;;  %v3688_v0 = vpop.eup %3687  ;;  %v1891_v23 = vsel %vm46_vm1, %v1719_v45, 0.0  ;;  %v1790_v42 = vmul.f32 %v5021_v17, %v3686_v9  ;;  %3707 = vtanh.f32 %v4817_v15  ;;  %v5764_v15 = vld [vmem:[#allocation6_spill] sm:$0xff] }
 0x175   :  { %v3690_v46 = vpop.eup %3689  ;;  %v2113_v28 = vsel %vm46_vm1, %v1793_v61, 0.0  ;;  %v1729_v29 = vmul.f32 %v5021_v17, %v3688_v0  ;;  %3709 = vtanh.f32 %v4739_v48 }
 0x176   :  { %v3692_v36 = vpop.eup %3691  ;;  %v2104_v34 = vsel %vm46_vm1, %v1790_v42, 0.0  ;;  %v1791_v27 = vmul.f32 %v5021_v17, %v3690_v46  ;;  %3711 = vtanh.f32 %v4822_v1  ;;  %v5766_v46 = vld [vmem:[#allocation7_spill] sm:$0xff] }
 0x177   :  { %v3694_v44 = vpop.eup %3693  ;;  %v1921_v10 = vsel %vm46_vm1, %v1729_v29, 0.0  ;;  %v1795_v21 = vmul.f32 %v5021_v17, %v3692_v36  ;;  %v1483_v1 = vadd.f32 %v4862_v3, %v5766_v46 }
 0x178   :  { %2111 = vadd.xlane.f32.xlu0 %v2110_v16  ;;  %1880 = vadd.xlane.f32.xlu1 %v1879_v39  ;;  %v3696_v30 = vpop.eup %3695  ;;  %v5050_v16 = vand.u32 127, %v5763_v59  ;;  %v2107_v26 = vsel %vm46_vm1, %v1791_v27, 0.0  ;;  %v1794_v20 = vmul.f32 %v5021_v17, %v3694_v44 }
 0x179   :  { %v3698_v39 = vpop.eup %3697  ;;  %v2119_v13 = vsel %vm46_vm1, %v1795_v21, 0.0  ;;  %v1731_v37 = vmul.f32 %v5021_v17, %v3696_v30 }
 0x17a   :  { %v2345_v32 = vadd.s32 4294967288, %v5050_v16  ;;  %v2116_v6 = vsel %vm46_vm1, %v1794_v20, 0.0  ;;  %v2352_v9 = vadd.s32 4294967280, %v5050_v16  ;;  %v2359_v44 = vadd.s32 4294967272, %v5050_v16 }
 0x17b   :  { %v1927_v48 = vsel %vm46_vm1, %v1731_v37, 0.0  ;;  %v2366_v31 = vadd.s32 4294967264, %v5050_v16  ;;  %v2373_v59 = vadd.s32 4294967256, %v5050_v16 }
 0x17c   :  { %1919 = vadd.xlane.f32.xlu0 %v1918_v63  ;;  %1895 = vadd.xlane.f32.xlu1 %v1894_v19  ;;  %v3700_v63 = vpop.eup %3699  ;;  %v1730_v19 = vmul.f32 %v5021_v17, %v3698_v39  ;;  %v5068_v61 = vsub.s32 %v2345_v32, %v5764_v15  ;;  %v5078_v29 = vsub.s32 %v2352_v9, %v5764_v15 }
 0x17d   :  { %v3702_v41 = vpop.eup %3701  ;;  %v1734_v0 = vmul.f32 %v5021_v17, %v3700_v63  ;;  %v5104_v9 = vsub.s32 %v2373_v59, %v5764_v15 }
 0x17e   :  { %v3704_v58 = vpop.eup %3703  ;;  %v1796_v42 = vmul.f32 %v5021_v17, %v3702_v41  ;;  %v1924_v5 = vsel %vm46_vm1, %v1730_v19, 0.0  ;;  %v5100_v19 = vsub.s32 %v2366_v31, %v5764_v15 }
 0x17f   :  { %v3706_v36 = vpop.eup %3705  ;;  %v1735_v3 = vmul.f32 %v5021_v17, %v3704_v58 }
 0x180   :  { %1916 = vadd.xlane.f32.xlu0 %v1915_v8  ;;  %1892 = vadd.xlane.f32.xlu1 %v1891_v23  ;;  %v5065_v8 = vsub.s32 %v5050_v16, %v5764_v15  ;;  %v5765_v23 = vld [vmem:[#allocation11_spill] sm:$0xff]  ;;  %v3708_v21 = vpop.eup %3707 }
 0x181   :  { %3713 = vtanh.f32 %v5765_v23  ;;  %v3710_v39 = vpop.eup %3709  ;;  %v1939_v37 = vsel %vm46_vm1, %v1735_v3, 0.0  ;;  %v1806_v63 = vmul.f32 %v5021_v17, %v3708_v21 }
 0x182   :  { %3715 = vtanh.f32 %v4855_v12  ;;  %v2122_v12 = vsel %vm46_vm1, %v1796_v42, 0.0  ;;  %v3712_v41 = vpop.eup %3711 }
 0x183   :  { %3717 = vtanh.f32 %v4753_v24  ;;  %v5094_v24 = vsub.s32 %v2359_v44, %v5764_v15 }
 0x184   :  { %2114 = vadd.xlane.f32.xlu0 %v2113_v28  ;;  %2105 = vadd.xlane.f32.xlu1 %v2104_v34  ;;  %3719 = vtanh.f32 %v1483_v1 }
 0x188   :  { %1922 = vadd.xlane.f32.xlu0 %v1921_v10  ;;  %2108 = vadd.xlane.f32.xlu1 %v2107_v26  ;;  %v1936_v10 = vsel %vm46_vm1, %v1734_v0, 0.0  ;;  %v1732_v26 = vmul.f32 %v5021_v17, %v3706_v36  ;;  %v1798_v0 = vmul.f32 %v5021_v17, %v3710_v39 }
 0x18a   :  { %v2128_v44 = vsel %vm46_vm1, %v1798_v0, 0.0 }
 0x18b   :  { %v3714_v23 = vpop.eup %3713 }
 0x18c   :  { %2120 = vadd.xlane.f32.xlu0 %v2119_v13  ;;  %2117 = vadd.xlane.f32.xlu1 %v2116_v6  ;;  %v5767_v6 = vld [vmem:[#allocation12_spill] sm:$0xff]  ;;  %v3716_v36 = vpop.eup %3715 }
 0x18d   :  { %v1827_v45 = vpop.xlane.xlu0 %1826  ;;  %3721 = vtanh.f32 %v5767_v6  ;;  %v3718_v21 = vpop.eup %3717 }
 0x18e   :  { %v2344_v34 = vrot.slane %v1827_v45, %v5065_v8  ;;  %3723 = vtanh.f32 %v4874_v52  ;;  %v3720_v39 = vpop.eup %3719 }
 0x18f   :  { %3725 = vtanh.f32 %v4763_v18 }
 0x190   :  { %1928 = vadd.xlane.f32.xlu0 %v1927_v48  ;;  %1925 = vadd.xlane.f32.xlu1 %v1924_v5  ;;  %v1842_v13 = vpop.xlane.xlu1 %1841  ;;  %v1930_v48 = vsel %vm46_vm1, %v1732_v26, 0.0  ;;  %v2152_v5 = vsel %vm46_vm1, %v1806_v63, 0.0  ;;  %3727 = vtanh.f32 %v4879_v53  ;;  %v1810_v26 = vmul.f32 %v5021_v17, %v3716_v36 }
 0x191   :  { %v1830_v28 = vpop.xlane.xlu0 %1829  ;;  %v2377_v52 = vrot.slane %v1842_v13, %v5104_v9  ;;  %v1733_v13 = vmul.f32 %v5021_v17, %v3718_v21 }
 0x192   :  { %v2349_v27 = vrot.slane %v1830_v28, %v5068_v61  ;;  %v1805_v28 = vmul.f32 %v5021_v17, %v3712_v41  ;;  %v1484_v41 = vadd.f32 %v5766_v46, %v4885_v47  ;;  %v2164_v0 = vsel %vm46_vm1, %v1810_v26, 0.0 }
 0x193   :  { %v1933_v47 = vsel %vm46_vm1, %v1733_v13, 0.0 }
 0x194   :  { %v2351_v30 = vsel %vm2350_vm2, %v2349_v27, %v2344_v34  ;;  %1937 = vadd.xlane.f32.xlu0 %v1936_v10  ;;  %2123 = vadd.xlane.f32.xlu1 %v2122_v12  ;;  %v1839_v1 = vpop.xlane.xlu1 %1838  ;;  %v1797_v10 = vmul.f32 %v5021_v17, %v3714_v23  ;;  %v2149_v59 = vsel %vm46_vm1, %v1805_v28, 0.0 }
 0x195   :  { %v1833_v20 = vpop.xlane.xlu0 %1832  ;;  %v2370_v34 = vrot.slane %v1839_v1, %v5100_v19 }
 0x196   :  { %v2356_v32 = vrot.slane %v1833_v20, %v5078_v29 }
 0x197   :  { %v3722_v63 = vpop.eup %3721 }
 0x198   :  { %v2358_v45 = vsel %vm2357_vm3, %v2356_v32, %v2351_v30  ;;  %1940 = vadd.xlane.f32.xlu0 %v1939_v37  ;;  %1931 = vadd.xlane.f32.xlu1 %v1930_v48  ;;  %v1485_v30 = vadd.f32 %v4881_v56, %v5766_v46  ;;  %v2019_v12 = vpop.xlane.xlu1 %2018  ;;  %v5768_v32 = vld [vmem:[#allocation13_spill] sm:$0xff]  ;;  %v2125_v56 = vsel %vm46_vm1, %v1797_v10, 0.0  ;;  %v3724_v23 = vpop.eup %3723  ;;  %v1800_v28 = vmul.f32 %v5021_v17, %v3722_v63 }
 0x199   :  { %v1836_v58 = vpop.xlane.xlu0 %1835  ;;  %3729 = vtanh.f32 %v5768_v32  ;;  %v2690_v53 = vrot.slane %v2019_v12, %v5065_v8  ;;  %v1812_v21 = vmul.f32 %v5021_v17, %v3724_v23 }
 0x19a   :  { %v2363_v42 = vrot.slane %v1836_v58, %v5094_v24  ;;  %3731 = vtanh.f32 %v1485_v30  ;;  %v1746_v58 = vmul.f32 %v5021_v17, %v3720_v39 }
 0x19b   :  { %v2170_v13 = vsel %vm46_vm1, %v1812_v21, 0.0 }
 0x19c   :  { %v2365_v27 = vsel %vm2364_vm4, %v2363_v42, %v2358_v45  ;;  %2153 = vadd.xlane.f32.xlu0 %v2152_v5  ;;  %2129 = vadd.xlane.f32.xlu1 %v2128_v44  ;;  %v2025_v45 = vpop.xlane.xlu1 %2024  ;;  %v5769_v42 = vld [vmem:[#allocation14_spill] sm:$0xff]  ;;  %v2380_v5 = vadd.s32 4294967248, %v5050_v16 }
 0x19d   :  { %v2022_v3 = vpop.xlane.xlu0 %2021  ;;  %v2372_v18 = vsel %vm2371_vm5, %v2370_v34, %v2365_v27  ;;  %3733 = vtanh.f32 %v5769_v42  ;;  %v2699_v1 = vrot.slane %v2025_v45, %v5078_v29  ;;  %v3726_v34 = vpop.eup %3725 }
 0x19e   :  { %v2694_v31 = vrot.slane %v2022_v3, %v5068_v61  ;;  %v5126_v20 = vsel %vm2378_vm6, %v2377_v52, %v2372_v18  ;;  %3735 = vtanh.f32 %v1484_v41  ;;  %v1972_v3 = vsel %vm46_vm1, %v1746_v58, 0.0  ;;  %v3728_v30 = vpop.eup %3727  ;;  %v5770_v41 = vld [vmem:[#allocation15_spill] sm:$0xff] }
 0x19f   :  { %3737 = vtanh.f32 %v4784_v38  ;;  %v2134_v38 = vsel %vm46_vm1, %v1800_v28, 0.0  ;;  %v1799_v26 = vmul.f32 %v5021_v17, %v3726_v34  ;;  %v5771_v28 = vld [vmem:[#allocation16_spill] sm:$0xff] }
 0x1a0   :  { %2150 = vadd.xlane.f32.xlu0 %v2149_v59  ;;  %2126 = vadd.xlane.f32.xlu1 %v2125_v56  ;;  %v2695_v6 = vsel %vm2350_vm2, %v2694_v31, %v2690_v53  ;;  %v2034_v44 = vpop.xlane.xlu1 %2033  ;;  %v5151_v31 = vsub.s32 %v2380_v5, %v5764_v15  ;;  %v2387_v59 = vadd.s32 4294967240, %v5050_v16  ;;  %3739 = vtanh.f32 %v4890_v51 }
 0x1a1   :  { %v2028_v37 = vpop.xlane.xlu0 %2027  ;;  %v2700_v27 = vsel %vm2357_vm3, %v2699_v1, %v2695_v6  ;;  %v2714_v18 = vrot.slane %v2034_v44, %v5104_v9  ;;  %3741 = vtanh.f32 %v5770_v41  ;;  %v2131_v51 = vsel %vm46_vm1, %v1799_v26, 0.0 }
 0x1a2   :  { %v2704_v48 = vrot.slane %v2028_v37, %v5094_v24  ;;  %v1811_v37 = vmul.f32 %v5021_v17, %v3728_v30  ;;  %v5164_v45 = vsub.s32 %v2387_v59, %v5764_v15  ;;  %3743 = vtanh.f32 %v4895_v14 }
 0x1a3   :  { %v3730_v32 = vpop.eup %3729  ;;  %3745 = vtanh.f32 %v5771_v28  ;;  %v2394_v59 = vadd.s32 4294967232, %v5050_v16  ;;  %v2401_v26 = vadd.s32 4294967224, %v5050_v16 }
 0x1a4   :  { %2165 = vadd.xlane.f32.xlu0 %v2164_v0  ;;  %1934 = vadd.xlane.f32.xlu1 %v1933_v47  ;;  %v2705_v10 = vsel %vm2364_vm4, %v2704_v48, %v2700_v27  ;;  %v2037_v56 = vpop.xlane.xlu1 %2036  ;;  %v3732_v63 = vpop.eup %3731  ;;  %v1736_v48 = vmul.f32 %v5021_v17, %v3730_v32  ;;  %v2167_v1 = vsel %vm46_vm1, %v1811_v37, 0.0  ;;  %3747 = vtanh.f32 %v4909_v54 }
 0x1a5   :  { %v2031_v36 = vpop.xlane.xlu0 %2030  ;;  %v2719_v6 = vrot.slane %v2037_v56, %v5151_v31  ;;  %v1748_v5 = vmul.f32 %v5021_v17, %v3732_v63  ;;  %3749 = vtanh.f32 %v4799_v22  ;;  %v1489_v22 = vadd.f32 %v4916_v11, %v5766_v46 }
 0x1a6   :  { %v2709_v52 = vrot.slane %v2031_v36, %v5100_v19  ;;  %v1942_v27 = vsel %vm46_vm1, %v1736_v48, 0.0  ;;  %3751 = vtanh.f32 %v4914_v60  ;;  %v5205_v41 = vsub.s32 %v2394_v59, %v5764_v15 }
 0x1a7   :  { %v3734_v58 = vpop.eup %3733  ;;  %v1978_v30 = vsel %vm46_vm1, %v1748_v5, 0.0  ;;  %3753 = vtanh.f32 %v4804_v35  ;;  %v5772_v5 = vld [vmem:[#allocation17_spill] sm:$0xff] }
 0x1a8   :  { %v2710_v12 = vsel %vm2371_vm5, %v2709_v52, %v2705_v10  ;;  %1973 = vadd.xlane.f32.xlu0 %v1972_v3  ;;  %2135 = vadd.xlane.f32.xlu1 %v2134_v38  ;;  %v2040_v42 = vpop.xlane.xlu1 %2039  ;;  %v3736_v47 = vpop.eup %3735  ;;  %v1802_v14 = vmul.f32 %v5021_v17, %v3734_v58  ;;  %3755 = vtanh.f32 %v1489_v22  ;;  %v1488_v58 = vadd.f32 %v5766_v46, %v4920_v55  ;;  %v5773_v22 = vld [vmem:[#allocation18_spill] sm:$0xff] }
 0x1a9   :  { %v1848_v39 = vpop.xlane.xlu0 %1847  ;;  %v2715_v53 = vsel %vm2378_vm6, %v2714_v18, %v2710_v12  ;;  %v2724_v36 = vrot.slane %v2040_v42, %v5164_v45  ;;  %v3738_v34 = vpop.eup %3737  ;;  %v1747_v18 = vmul.f32 %v5021_v17, %v3736_v47  ;;  %3757 = vtanh.f32 %v5772_v5 }
 0x1aa   :  { %v2720_v23 = vsel %vm2385_vm7, %v2719_v6, %v2715_v53  ;;  %v2391_v21 = vrot.slane %v1848_v39, %v5164_v45  ;;  %v3740_v12 = vpop.eup %3739  ;;  %v2140_v38 = vsel %vm46_vm1, %v1802_v14, 0.0  ;;  %v1801_v32 = vmul.f32 %v5021_v17, %v3738_v34 }
 0x1ab   :  { %v2725_v44 = vsel %vm2392_vm8, %v2724_v36, %v2720_v23  ;;  %v3742_v56 = vpop.eup %3741  ;;  %v1814_v37 = vmul.f32 %v5021_v17, %v3740_v12  ;;  %v5208_v6 = vsub.s32 %v2401_v26, %v5764_v15  ;;  %3759 = vtanh.f32 %v1488_v58 }
 0x1ac   :  { %2171 = vadd.xlane.f32.xlu0 %v2170_v13  ;;  %2132 = vadd.xlane.f32.xlu1 %v2131_v51  ;;  %v5181_v3 = vpop.xlane.xlu1 %2015  ;;  %v1975_v13 = vsel %vm46_vm1, %v1747_v18, 0.0  ;;  %v3744_v63 = vpop.eup %3743  ;;  %v2137_v60 = vsel %vm46_vm1, %v1801_v32, 0.0  ;;  %v1738_v11 = vmul.f32 %v5021_v17, %v3742_v56  ;;  %3761 = vtanh.f32 %v4813_v4 }
 0x1ad   :  { %v5168_v0 = vpop.xlane.xlu0 %2012  ;;  %v3746_v48 = vpop.eup %3745  ;;  %v2176_v23 = vsel %vm46_vm1, %v1814_v37, 0.0  ;;  %v1813_v42 = vmul.f32 %v5021_v17, %v3744_v63  ;;  %3763 = vtanh.f32 %v4927_v43  ;;  %v2415_v43 = vadd.s32 4294967208, %v5050_v16 }
 0x1ae   :  { %v1948_v36 = vsel %vm46_vm1, %v1738_v11, 0.0  ;;  %v1737_v55 = vmul.f32 %v5021_v17, %v3746_v48  ;;  %3765 = vtanh.f32 %v5773_v22  ;;  %v1491_v48 = vadd.f32 %v4934_v25, %v5766_v46 }
 0x1af   :  { %3767 = vtanh.f32 %v4932_v57  ;;  %v5261_v25 = vsub.s32 %v2415_v43, %v5764_v15 }
 0x1b0   :  { %2168 = vadd.xlane.f32.xlu0 %v2167_v1  ;;  %1943 = vadd.xlane.f32.xlu1 %v1942_v27  ;;  %v3748_v1 = vpop.eup %3747  ;;  %v1945_v12 = vsel %vm46_vm1, %v1737_v55, 0.0 }
 0x1b1   :  { %v1845_v52 = vpop.xlane.xlu0 %1844  ;;  %v3750_v27 = vpop.eup %3749 }
 0x1b2   :  { %v2384_v10 = vrot.slane %v1845_v52, %v5151_v31  ;;  %v3752_v18 = vpop.eup %3751  ;;  %v1804_v59 = vmul.f32 %v5021_v17, %v3750_v27  ;;  %v5775_v27 = vld [vmem:[#allocation28_spill] sm:$0xff] }
 0x1b3   :  { %v1815_v32 = vmul.f32 %v5021_v17, %v3752_v18 }
 0x1b4   :  { %v2386_v54 = vsel %vm2385_vm7, %v2384_v10, %v5126_v20  ;;  %1979 = vadd.xlane.f32.xlu0 %v1978_v30  ;;  %2141 = vadd.xlane.f32.xlu1 %v2140_v38  ;;  %v2173_v10 = vsel %vm46_vm1, %v1813_v42, 0.0  ;;  %v1816_v30 = vmul.f32 %v5021_v17, %v3748_v1  ;;  %v3754_v38 = vpop.eup %3753  ;;  %v2146_v37 = vsel %vm46_vm1, %v1804_v59, 0.0 }
 0x1b5   :  { %v5193_v39 = vpop.xlane.xlu0 %2063  ;;  %v5196_v53 = vsel %vm2392_vm8, %v2391_v21, %v2386_v54  ;;  %v2046_v20 = vpop.xlane.xlu1 %2045  ;;  %v1803_v63 = vmul.f32 %v5021_v17, %v3754_v38 }
 0x1b6   :  { %v2734_v28 = vrot.slane %v2046_v20, %v5208_v6  ;;  %v2182_v26 = vsel %vm46_vm1, %v1816_v30, 0.0  ;;  %v3756_v56 = vpop.eup %3755  ;;  %v2408_v20 = vadd.s32 4294967216, %v5050_v16 }
 0x1b7   :  { %v3758_v11 = vpop.eup %3757  ;;  %v1752_v1 = vmul.f32 %v5021_v17, %v3756_v56 }
 0x1b8   :  { %1976 = vadd.xlane.f32.xlu0 %v1975_v13  ;;  %2138 = vadd.xlane.f32.xlu1 %v2137_v60  ;;  %v3760_v5 = vpop.eup %3759  ;;  %v5258_v57 = vsub.s32 %v2408_v20, %v5764_v15 }
 0x1b9   :  { %v5212_v51 = vpop.xlane.xlu0 %2060  ;;  %v2043_v35 = vpop.xlane.xlu1 %2042  ;;  %v1751_v30 = vmul.f32 %v5021_v17, %v3760_v5 }
 0x1ba   :  { %v2729_v47 = vrot.slane %v2043_v35, %v5205_v41  ;;  %v3762_v55 = vpop.eup %3761 }
 0x1bb   :  { %v3764_v18 = vpop.eup %3763  ;;  %v1987_v20 = vsel %vm46_vm1, %v1751_v30, 0.0 }
 0x1bc   :  { %2177 = vadd.xlane.f32.xlu0 %v2176_v23  ;;  %v2730_v14 = vsel %vm2399_vm9, %v2729_v47, %v2725_v44  ;;  %1949 = vadd.xlane.f32.xlu1 %v1948_v36  ;;  %v2179_v23 = vsel %vm46_vm1, %v1815_v32, 0.0  ;;  %v5774_v47 = vld [vmem:[#allocation19_spill] sm:$0xff]  ;;  %v3766_v56 = vpop.eup %3765 }
 0x1bd   :  { %v5223_v34 = vpop.xlane.xlu0 %2066  ;;  %v1854_v52 = vpop.xlane.xlu1 %1853  ;;  %v2735_v21 = vsel %vm2406_vm10, %v2734_v28, %v2730_v14  ;;  %3769 = vtanh.f32 %v5774_v47  ;;  %v1740_v28 = vmul.f32 %v5021_v17, %v3758_v11  ;;  %v1490_v14 = vadd.f32 %v5766_v46, %v5775_v27 }
 0x1be   :  { %v2405_v13 = vrot.slane %v1854_v52, %v5208_v6  ;;  %3771 = vtanh.f32 %v1491_v48  ;;  %v3768_v43 = vpop.eup %3767  ;;  %v1742_v48 = vmul.f32 %v5021_v17, %v3766_v56 }
 0x1bf   :  { %v1817_v5 = vmul.f32 %v5021_v17, %v3768_v43  ;;  %v2436_v43 = vadd.s32 4294967184, %v5050_v16 }
 0x1c0   :  { %2174 = vadd.xlane.f32.xlu0 %v2173_v10  ;;  %1946 = vadd.xlane.f32.xlu1 %v1945_v12  ;;  %v1990_v10 = vsel %vm46_vm1, %v1752_v1, 0.0  ;;  %v5776_v12 = vld [vmem:[#allocation21_spill] sm:$0xff] }
 0x1c1   :  { %v5232_v54 = vpop.xlane.xlu0 %2081  ;;  %v1851_v44 = vpop.xlane.xlu1 %1850  ;;  %3773 = vtanh.f32 %v5776_v12  ;;  %v5780_v12 = vld [vmem:[#allocation30_spill] sm:$0xff]  ;;  %v2185_v56 = vsel %vm46_vm1, %v1817_v5, 0.0 }
 0x1c2   :  { %v2398_v4 = vrot.slane %v1851_v44, %v5205_v41  ;;  %v1954_v44 = vsel %vm46_vm1, %v1740_v28, 0.0  ;;  %3775 = vtanh.f32 %v1490_v14  ;;  %v5779_v28 = vld [vmem:[#allocation25_spill] sm:$0xff]  ;;  %v2422_v14 = vadd.s32 4294967200, %v5050_v16 }
 0x1c4   :  { %2183 = vadd.xlane.f32.xlu0 %v2182_v26  ;;  %v2400_v58 = vsel %vm2399_vm9, %v2398_v4, %v5196_v53  ;;  %2147 = vadd.xlane.f32.xlu1 %v2146_v37  ;;  %v2143_v53 = vsel %vm46_vm1, %v1803_v63, 0.0  ;;  %v1739_v26 = vmul.f32 %v5021_v17, %v3762_v55  ;;  %v1818_v37 = vmul.f32 %v5021_v17, %v3764_v18  ;;  %v5777_v63 = vld [vmem:[#allocation22_spill] sm:$0xff] }
 0x1c5   :  { %v5244_v60 = vpop.xlane.xlu0 %2078  ;;  %v2052_v35 = vpop.xlane.xlu1 %2051  ;;  %v5253_v42 = vsel %vm2406_vm10, %v2405_v13, %v2400_v58  ;;  %3777 = vtanh.f32 %v5777_v63  ;;  %v1482_v55 = vadd.f32 %v5766_v46, %v5779_v28  ;;  %v5318_v63 = vsub.s32 %v2422_v14, %v5764_v15 }
 0x1c6   :  { %v2744_v38 = vrot.slane %v2052_v35, %v5261_v25  ;;  %v1951_v11 = vsel %vm46_vm1, %v1739_v26, 0.0  ;;  %3779 = vtanh.f32 %v4950_v7  ;;  %v1493_v35 = vadd.f32 %v4952_v2, %v5766_v46 }
 0x1c7   :  { %v2188_v1 = vsel %vm46_vm1, %v1818_v37, 0.0  ;;  %v1960_v2 = vsel %vm46_vm1, %v1742_v48, 0.0  ;;  %v5781_v37 = vld [vmem:[#allocation24_spill] sm:$0xff]  ;;  %v5339_v14 = vsub.s32 %v2436_v43, %v5764_v15 }
 0x1c8   :  { %2180 = vadd.xlane.f32.xlu0 %v2179_v23  ;;  %2144 = vadd.xlane.f32.xlu1 %v2143_v53  ;;  %v5778_v53 = vld [vmem:[#allocation23_spill] sm:$0xff] }
 0x1c9   :  { %v5265_v36 = vpop.xlane.xlu0 %1889  ;;  %v2049_v52 = vpop.xlane.xlu1 %2048  ;;  %3781 = vtanh.f32 %v5778_v53 }
 0x1ca   :  { %v2739_v59 = vrot.slane %v2049_v52, %v5258_v57  ;;  %v2429_v52 = vadd.s32 4294967192, %v5050_v16  ;;  %3783 = vtanh.f32 %v1493_v35 }
 0x1cb   :  { %3785 = vtanh.f32 %v5781_v37 }
 0x1cc   :  { %1991 = vadd.xlane.f32.xlu0 %v1990_v10  ;;  %v2740_v22 = vsel %vm2413_vm11, %v2739_v59, %v2735_v21  ;;  %1955 = vadd.xlane.f32.xlu1 %v1954_v44  ;;  %v3770_v21 = vpop.eup %3769  ;;  %v1492_v59 = vadd.f32 %v5766_v46, %v5780_v12  ;;  %v2443_v44 = vadd.s32 4294967176, %v5050_v16  ;;  %3787 = vtanh.f32 %v1482_v55 }
 0x1cd   :  { %v5276_v32 = vpop.xlane.xlu0 %1886  ;;  %v1860_v4 = vpop.xlane.xlu1 %1859  ;;  %v5281_v13 = vsel %vm2420_vm12, %v2744_v38, %v2740_v22  ;;  %v1741_v10 = vmul.f32 %v5021_v17, %v3770_v21  ;;  %v1495_v16 = vadd.f32 %v4968_v40, %v5766_v46 }
 0x1ce   :  { %v3772_v47 = vpop.eup %3771  ;;  %v2419_v7 = vrot.slane %v1860_v4, %v5261_v25  ;;  %3789 = vtanh.f32 %v1492_v59  ;;  %v5332_v5 = vsub.s32 %v2443_v44, %v5764_v15 }
 0x1cf   :  { %v3774_v18 = vpop.eup %3773  ;;  %v1754_v4 = vmul.f32 %v5021_v17, %v3772_v47  ;;  %3791 = vtanh.f32 %v1495_v16 }
 0x1d0   :  { %1988 = vadd.xlane.f32.xlu0 %v1987_v20  ;;  %1952 = vadd.xlane.f32.xlu1 %v1951_v11  ;;  %v3776_v20 = vpop.eup %3775  ;;  %v1957_v11 = vsel %vm46_vm1, %v1741_v10, 0.0  ;;  %v1807_v48 = vmul.f32 %v5021_v17, %v3774_v18  ;;  %v2764_v12 = vrot.slane %v5193_v39, %v5332_v5 }
 0x1d1   :  { %v5287_v58 = vpop.xlane.xlu0 %2087  ;;  %v1857_v23 = vpop.xlane.xlu1 %1856  ;;  %v1996_v53 = vsel %vm46_vm1, %v1754_v4, 0.0  ;;  %v1753_v28 = vmul.f32 %v5021_v17, %v3776_v20  ;;  %v5783_v4 = vld [vmem:[#allocation27_spill] sm:$0xff] }
 0x1d2   :  { %v2412_v27 = vrot.slane %v1857_v23, %v5258_v57  ;;  %v3778_v35 = vpop.eup %3777  ;;  %v5782_v23 = vld [vmem:[#allocation26_spill] sm:$0xff] }
 0x1d3   :  { %v3780_v55 = vpop.eup %3779  ;;  %v1993_v44 = vsel %vm46_vm1, %v1753_v28, 0.0 }
 0x1d4   :  { %2189 = vadd.xlane.f32.xlu0 %v2188_v1  ;;  %v2414_v38 = vsel %vm2413_vm11, %v2412_v27, %v5253_v42  ;;  %1961 = vadd.xlane.f32.xlu1 %v1960_v2  ;;  %v5321_v42 = vsub.s32 %v2429_v52, %v5764_v15  ;;  %v1487_v1 = vadd.f32 %v5782_v23, %v5766_v46  ;;  %v2155_v2 = vsel %vm46_vm1, %v1807_v48, 0.0  ;;  %v3782_v18 = vpop.eup %3781 }
 0x1d5   :  { %v5303_v30 = vpop.xlane.xlu0 %2084  ;;  %v2058_v26 = vpop.xlane.xlu1 %2057  ;;  %v5312_v22 = vsel %vm2420_vm12, %v2419_v7, %v2414_v38  ;;  %v1494_v27 = vadd.f32 %v5766_v46, %v4972_v33  ;;  %v1744_v52 = vmul.f32 %v5021_v17, %v3778_v35  ;;  %v2759_v33 = vrot.slane %v5212_v51, %v5339_v14 }
 0x1d6   :  { %v2754_v7 = vrot.slane %v2058_v26, %v5321_v42  ;;  %v1819_v26 = vmul.f32 %v5021_v17, %v3780_v55  ;;  %3793 = vtanh.f32 %v1487_v1  ;;  %v1486_v51 = vadd.f32 %v5766_v46, %v5783_v4 }
 0x1d7   :  { %v1743_v37 = vmul.f32 %v5021_v17, %v3782_v18  ;;  %3795 = vtanh.f32 %v1494_v27  ;;  %v2769_v4 = vrot.slane %v5223_v34, %v5065_v8  ;;  %v5786_v34 = vld [vmem:[#allocation20_spill] sm:$0xff] }
 0x1d8   :  { %2186 = vadd.xlane.f32.xlu0 %v2185_v56  ;;  %1958 = vadd.xlane.f32.xlu1 %v1957_v11  ;;  %v3784_v56 = vpop.eup %3783  ;;  %v2191_v23 = vsel %vm46_vm1, %v1819_v26, 0.0  ;;  %3797 = vtanh.f32 %v1486_v51 }
 0x1d9   :  { %v5325_v21 = vpop.xlane.xlu0 %2093  ;;  %v2055_v47 = vpop.xlane.xlu1 %2054  ;;  %v1756_v46 = vmul.f32 %v5021_v17, %v3784_v56  ;;  %3799 = vtanh.f32 %v4961_v62  ;;  %v5785_v56 = vld [vmem:[#allocation31_spill] sm:$0xff] }
 0x1da   :  { %v2749_v40 = vrot.slane %v2055_v47, %v5318_v63  ;;  %v3786_v11 = vpop.eup %3785 }
 0x1db   :  { %v3788_v48 = vpop.eup %3787  ;;  %v1809_v28 = vmul.f32 %v5021_v17, %v3786_v11 }
 0x1dc   :  { %1997 = vadd.xlane.f32.xlu0 %v1996_v53  ;;  %v2750_v15 = vsel %vm2427_vm13, %v2749_v40, %v5281_v13  ;;  %2156 = vadd.xlane.f32.xlu1 %v2155_v2  ;;  %v1966_v13 = vsel %vm46_vm1, %v1744_v52, 0.0  ;;  %v3790_v1 = vpop.eup %3789  ;;  %v1963_v53 = vsel %vm46_vm1, %v1743_v37, 0.0  ;;  %v2002_v2 = vsel %vm46_vm1, %v1756_v46, 0.0 }
 0x1dd   :  { %v5345_v10 = vpop.xlane.xlu0 %2090  ;;  %v2755_v59 = vsel %vm2434_vm14, %v2754_v7, %v2750_v15  ;;  %v1866_v38 = vpop.xlane.xlu1 %1865  ;;  %v1755_v52 = vmul.f32 %v5021_v17, %v3790_v1  ;;  %v2161_v15 = vsel %vm46_vm1, %v1809_v28, 0.0 }
 0x1de   :  { %v2760_v20 = vsel %vm2441_vm15, %v2759_v33, %v2755_v59  ;;  %v2433_v47 = vrot.slane %v1866_v38, %v5321_v42  ;;  %v3792_v18 = vpop.eup %3791  ;;  %v5784_v33 = vld [vmem:[#allocation29_spill] sm:$0xff] }
 0x1df   :  { %v5364_v43 = vsel %vm2448_vm0, %v2764_v12, %v2760_v20  ;;  %3801 = vtanh.f32 %v5784_v33  ;;  %v1745_v12 = vmul.f32 %v5021_v17, %v3788_v48  ;;  %v1999_v38 = vsel %vm46_vm1, %v1755_v52, 0.0 }
 0x1e0   :  { %1994 = vadd.xlane.f32.xlu0 %v1993_v44  ;;  %1967 = vadd.xlane.f32.xlu1 %v1966_v13  ;;  %v3794_v59 = vpop.eup %3793  ;;  %3803 = vtanh.f32 %v4985_v50  ;;  %v1758_v44 = vmul.f32 %v5021_v17, %v3792_v18 }
 0x1e1   :  { %v5361_v39 = vpop.xlane.xlu0 %1901  ;;  %v1863_v35 = vpop.xlane.xlu1 %1862  ;;  %3805 = vtanh.f32 %v5785_v56  ;;  %v1969_v20 = vsel %vm46_vm1, %v1745_v12, 0.0  ;;  %v1750_v13 = vmul.f32 %v5021_v17, %v3794_v59 }
 0x1e2   :  { %v2426_v16 = vrot.slane %v1863_v35, %v5318_v63  ;;  %v3796_v26 = vpop.eup %3795  ;;  %v2008_v35 = vsel %vm46_vm1, %v1758_v44, 0.0  ;;  %3807 = vtanh.f32 %v5786_v34 }
 0x1e3   :  { %v3798_v37 = vpop.eup %3797  ;;  %3809 = vtanh.f32 %v4980_v49 }
 0x1e4   :  { %2192 = vadd.xlane.f32.xlu0 %v2191_v23  ;;  %v2428_v27 = vsel %vm2427_vm13, %v2426_v16, %v5312_v22  ;;  %1964 = vadd.xlane.f32.xlu1 %v1963_v53  ;;  %v1757_v23 = vmul.f32 %v5021_v17, %v3796_v26  ;;  %v3800_v46 = vpop.eup %3799  ;;  %v1749_v53 = vmul.f32 %v5021_v17, %v3798_v37 }
 0x1e5   :  { %v5372_v55 = vpop.xlane.xlu0 %1898  ;;  %v1872_v40 = vpop.xlane.xlu1 %1871  ;;  %v2435_v7 = vsel %vm2434_vm14, %v2433_v47, %v2428_v27  ;;  %v1984_v47 = vsel %vm46_vm1, %v1750_v13, 0.0 }
 0x1e6   :  { %v2447_v16 = vrot.slane %v1872_v40, %v5332_v5  ;;  %v2005_v33 = vsel %vm46_vm1, %v1757_v23, 0.0  ;;  %v1981_v40 = vsel %vm46_vm1, %v1749_v53, 0.0 }
 0x1e8   :  { %2003 = vadd.xlane.f32.xlu0 %v2002_v2  ;;  %2162 = vadd.xlane.f32.xlu1 %v2161_v15  ;;  %v1822_v15 = vmul.f32 %v5021_v17, %v3800_v46 }
 0x1e9   :  { %v5383_v62 = vpop.xlane.xlu0 %2099  ;;  %v2070_v22 = vpop.xlane.xlu1 %2069 }
 0x1ea   :  { %v2773_v51 = vrot.slane %v2070_v22, %v5068_v61  ;;  %v3802_v27 = vpop.eup %3801  ;;  %v2200_v44 = vsel %vm46_vm1, %v1822_v15, 0.0 }
 0x1eb   :  { %v3804_v12 = vpop.eup %3803  ;;  %v1820_v59 = vmul.f32 %v5021_v17, %v3802_v27 }
 0x1ec   :  { %2000 = vadd.xlane.f32.xlu0 %v1999_v38  ;;  %v2774_v11 = vsel %vm2350_vm2, %v2773_v51, %v2769_v4  ;;  %1970 = vadd.xlane.f32.xlu1 %v1969_v20  ;;  %v1823_v26 = vmul.f32 %v5021_v17, %v3804_v12  ;;  %v2793_v12 = vrot.slane %v5232_v54, %v5104_v9 }
 0x1ed   :  { %v5394_v50 = vpop.xlane.xlu0 %2096  ;;  %v1869_v48 = vpop.xlane.xlu1 %1868  ;;  %v2194_v49 = vsel %vm46_vm1, %v1820_v59, 0.0 }
 0x1ee   :  { %v2440_v1 = vrot.slane %v1869_v48, %v5339_v14 }
 0x1f0   :  { %2009 = vadd.xlane.f32.xlu0 %v2008_v35  ;;  %v2442_v2 = vsel %vm2441_vm15, %v2440_v1, %v2435_v7  ;;  %1985 = vadd.xlane.f32.xlu1 %v1984_v47  ;;  %v3806_v7 = vpop.eup %3805  ;;  %v2203_v35 = vsel %vm46_vm1, %v1823_v26, 0.0 }
 0x1f1   :  { %v5404_v28 = vpop.xlane.xlu0 %1907  ;;  %v5408_v52 = vsel %vm2448_vm0, %v2447_v16, %v2442_v2  ;;  %v1878_v18 = vpop.xlane.xlu1 %1877  ;;  %v1821_v51 = vmul.f32 %v5021_v17, %v3806_v7  ;;  %v3816_v2 = vld [vmem:[%s5727_s7] ss:$0 sm:$0xff]  ;;  %v2798_v7 = vrot.slane %v5303_v30, %v5151_v31 }
 0x1f2   :  { %v2457_v56 = vrot.slane %v1878_v18, %v5068_v61  ;;  %v3808_v13 = vpop.eup %3807 }
 0x1f3   :  { %v2197_v23 = vsel %vm46_vm1, %v1821_v51, 0.0  ;;  %v1808_v46 = vmul.f32 %v5021_v17, %v3808_v13  ;;  %v3810_v1 = vpop.eup %3809  ;;  %v2788_v17 = vrot.slane %v5244_v60, %v5100_v19 }
 0x1f4   :  { %2006 = vadd.xlane.f32.xlu0 %v2005_v33  ;;  %1982 = vadd.xlane.f32.xlu1 %v1981_v40  ;;  %v1824_v18 = vmul.f32 %v3816_v2, %v3810_v1 }
 0x1f5   :  { %v5415_v22 = vpop.xlane.xlu0 %1904  ;;  %v1875_v38 = vpop.xlane.xlu1 %1874  ;;  %v2158_v27 = vsel %vm46_vm1, %v1808_v46, 0.0 }
 0x1f6   :  { %v2453_v4 = vrot.slane %v1875_v38, %v5065_v8  ;;  %v2206_v60 = vsel %vm46_vm1, %v1824_v18, 0.0  ;;  %v2477_v18 = vrot.slane %v5265_v36, %v5104_v9  ;;  %v2502_v36 = vrot.slane %v5415_v22, %v5258_v57 }
 0x1f7   :  { %vm3003_vm1 = vcmask 1041409  }
 0x1f8   :  { %2201 = vadd.xlane.f32.xlu0 %v2200_v44  ;;  %v2458_v37 = vsel %vm2350_vm2, %v2457_v56, %v2453_v4  ;;  %2195 = vadd.xlane.f32.xlu1 %v2194_v49  ;;  %v2803_v44 = vrot.slane %v5287_v58, %v5164_v45  ;;  %v2808_v56 = vrot.slane %v5345_v10, %v5205_v41 }
 0x1f9   :  { %v2103_v20 = vpop.xlane.xlu0 %2102  ;;  %v2076_v48 = vpop.xlane.xlu1 %2075  ;;  %v2813_v4 = vrot.slane %v5325_v21, %v5208_v6  ;;  %v2818_v58 = vrot.slane %v5394_v50, %v5258_v57  ;;  %v2472_v21 = vrot.slane %v5276_v32, %v5100_v19 }
 0x1fa   :  { %v2783_v53 = vrot.slane %v2076_v48, %v5094_v24  ;;  %v2823_v48 = vrot.slane %v5383_v62, %v5261_v25  ;;  %v2828_v1 = vrot.slane %v2103_v20, %v5318_v63 }
 0x1fc   :  { %2204 = vadd.xlane.f32.xlu0 %v2203_v35  ;;  %2198 = vadd.xlane.f32.xlu1 %v2197_v23 }
 0x1fd   :  { %v5427_v34 = vpop.xlane.xlu0 %1913  ;;  %v2073_v16 = vpop.xlane.xlu1 %2072 }
 0x1fe   :  { %v2778_v47 = vrot.slane %v2073_v16, %v5078_v29  ;;  %v2517_v22 = vrot.slane %v5427_v34, %v5321_v42 }
 0x200   :  { %v2779_v15 = vsel %vm2357_vm3, %v2778_v47, %v2774_v11  ;;  %2159 = vadd.xlane.f32.xlu1 %v2158_v27 }
 0x201   :  { %v5435_v33 = vpop.xlane.xlu0 %1910  ;;  %v2784_v40 = vsel %vm2364_vm4, %v2783_v53, %v2779_v15  ;;  %v1884_v59 = vpop.xlane.xlu1 %1883 }
 0x202   :  { %v2789_v38 = vsel %vm2371_vm5, %v2788_v17, %v2784_v40  ;;  %v2467_v10 = vrot.slane %v1884_v59, %v5094_v24  ;;  %v2497_v59 = vrot.slane %v5361_v39, %v5208_v6 }
 0x203   :  { %v2794_v26 = vsel %vm2378_vm6, %v2793_v12, %v2789_v38  ;;  %v2492_v12 = vrot.slane %v5372_v55, %v5205_v41 }
 0x204   :  { %v2799_v54 = vsel %vm2385_vm7, %v2798_v7, %v2794_v26  ;;  %2207 = vadd.xlane.f32.xlu1 %v2206_v60  ;;  %v2507_v60 = vrot.slane %v5404_v28, %v5261_v25 }
 0x205   :  { %v2112_v11 = vpop.xlane.xlu0 %2111  ;;  %v2804_v30 = vsel %vm2392_vm8, %v2803_v44, %v2799_v54  ;;  %v1881_v49 = vpop.xlane.xlu1 %1880  ;;  %v2512_v54 = vrot.slane %v5435_v33, %v5318_v63 }
 0x206   :  { %v2809_v51 = vsel %vm2399_vm9, %v2808_v56, %v2804_v30  ;;  %v2462_v13 = vrot.slane %v1881_v49, %v5078_v29 }
 0x207   :  { %v2814_v35 = vsel %vm2406_vm10, %v2813_v4, %v2809_v51 }
 0x208   :  { %v2819_v46 = vsel %vm2413_vm11, %v2818_v58, %v2814_v35  ;;  %v2463_v50 = vsel %vm2357_vm3, %v2462_v13, %v2458_v37  ;;  %v2843_v13 = vrot.slane %v2112_v11, %v5332_v5 }
 0x209   :  { %v1920_v23 = vpop.xlane.xlu0 %1919  ;;  %v2824_v16 = vsel %vm2420_vm12, %v2823_v48, %v2819_v46  ;;  %v2468_v47 = vsel %vm2364_vm4, %v2467_v10, %v2463_v50  ;;  %v1896_v53 = vpop.xlane.xlu1 %1895 }
 0x20a   :  { %v2829_v62 = vsel %vm2427_vm13, %v2828_v1, %v2824_v16  ;;  %v2473_v27 = vsel %vm2371_vm5, %v2472_v21, %v2468_v47  ;;  %v2487_v20 = vrot.slane %v1896_v53, %v5164_v45  ;;  %v2527_v33 = vrot.slane %v1920_v23, %v5332_v5 }
 0x20b   :  { %v2478_v37 = vsel %vm2378_vm6, %v2477_v18, %v2473_v27 }
 0x20d   :  { %v1917_v2 = vpop.xlane.xlu0 %1916  ;;  %v1893_v32 = vpop.xlane.xlu1 %1892 }
 0x20e   :  { %v2482_v17 = vrot.slane %v1893_v32, %v5151_v31  ;;  %v2522_v30 = vrot.slane %v1917_v2, %v5339_v14 }
 0x210   :  { %v2483_v40 = vsel %vm2385_vm7, %v2482_v17, %v2478_v37 }
 0x211   :  { %v2115_v15 = vpop.xlane.xlu0 %2114  ;;  %v2488_v7 = vsel %vm2392_vm8, %v2487_v20, %v2483_v40  ;;  %v2106_v38 = vpop.xlane.xlu1 %2105 }
 0x212   :  { %v2493_v44 = vsel %vm2399_vm9, %v2492_v12, %v2488_v7  ;;  %v2833_v26 = vrot.slane %v2106_v38, %v5321_v42  ;;  %v2848_v34 = vrot.slane %v2115_v15, %v5065_v8 }
 0x213   :  { %v2498_v55 = vsel %vm2406_vm10, %v2497_v59, %v2493_v44 }
 0x214   :  { %v2834_v39 = vsel %vm2434_vm14, %v2833_v26, %v2829_v62  ;;  %v2503_v4 = vsel %vm2413_vm11, %v2502_v36, %v2498_v55 }
 0x215   :  { %v1923_v56 = vpop.xlane.xlu0 %1922  ;;  %v2109_v49 = vpop.xlane.xlu1 %2108  ;;  %v2508_v58 = vsel %vm2420_vm12, %v2507_v60, %v2503_v4 }
 0x216   :  { %v2838_v28 = vrot.slane %v2109_v49, %v5339_v14  ;;  %v2513_v51 = vsel %vm2427_vm13, %v2512_v54, %v2508_v58  ;;  %v2532_v62 = vrot.slane %v1923_v56, %v5065_v8 }
 0x217   :  { %v2518_v48 = vsel %vm2434_vm14, %v2517_v22, %v2513_v51 }
 0x218   :  { %v2839_v35 = vsel %vm2441_vm15, %v2838_v28, %v2834_v39  ;;  %v2523_v21 = vsel %vm2441_vm15, %v2522_v30, %v2518_v48 }
 0x219   :  { %v2121_v10 = vpop.xlane.xlu0 %2120  ;;  %v5508_v46 = vsel %vm2448_vm0, %v2843_v13, %v2839_v35  ;;  %v2528_v1 = vsel %vm2448_vm0, %v2527_v33, %v2523_v21  ;;  %v2118_v50 = vpop.xlane.xlu1 %2117 }
 0x21a   :  { %v2857_v11 = vrot.slane %v2121_v10, %v5078_v29  ;;  %v5513_v23 = vsel %vm3003_vm1, %v2528_v1, %v5408_v52  ;;  %v2852_v16 = vrot.slane %v2118_v50, %v5068_v61  ;;  %vm3005_vm1 = vcmask 1042434  }
 0x21c   :  { %v2853_v53 = vsel %vm2350_vm2, %v2852_v16, %v2848_v34 }
 0x21d   :  { %v1929_v47 = vpop.xlane.xlu0 %1928  ;;  %v1926_v27 = vpop.xlane.xlu1 %1925  ;;  %v2858_v2 = vsel %vm2357_vm3, %v2857_v11, %v2853_v53 }
 0x21e   :  { %v2541_v18 = vrot.slane %v1929_v47, %v5078_v29  ;;  %v2536_v32 = vrot.slane %v1926_v27, %v5068_v61 }
 0x220   :  { %v2537_v20 = vsel %vm2350_vm2, %v2536_v32, %v2532_v62 }
 0x221   :  { %v1938_v17 = vpop.xlane.xlu0 %1937  ;;  %v2124_v37 = vpop.xlane.xlu1 %2123  ;;  %v2542_v52 = vsel %vm2357_vm3, %v2541_v18, %v2537_v20 }
 0x222   :  { %v2862_v15 = vrot.slane %v2124_v37, %v5094_v24  ;;  %v2556_v49 = vrot.slane %v1938_v17, %v5104_v9 }
 0x224   :  { %v2863_v40 = vsel %vm2364_vm4, %v2862_v15, %v2858_v2 }
 0x225   :  { %v1941_v12 = vpop.xlane.xlu0 %1940  ;;  %v1932_v59 = vpop.xlane.xlu1 %1931 }
 0x226   :  { %v2546_v7 = vrot.slane %v1932_v59, %v5094_v24  ;;  %v2561_v28 = vrot.slane %v1941_v12, %v5151_v31 }
 0x228   :  { %v2547_v36 = vsel %vm2364_vm4, %v2546_v7, %v2542_v52 }
 0x229   :  { %v2154_v38 = vpop.xlane.xlu0 %2153  ;;  %v2130_v44 = vpop.xlane.xlu1 %2129 }
 0x22a   :  { %v2872_v56 = vrot.slane %v2130_v44, %v5104_v9 }
 0x22d   :  { %v2151_v26 = vpop.xlane.xlu0 %2150  ;;  %v2127_v60 = vpop.xlane.xlu1 %2126 }
 0x22e   :  { %v2867_v55 = vrot.slane %v2127_v60, %v5100_v19 }
 0x230   :  { %v2868_v39 = vsel %vm2371_vm5, %v2867_v55, %v2863_v40 }
 0x231   :  { %v5529_v54 = vpop.xlane.xlu0 %2165  ;;  %v1935_v4 = vpop.xlane.xlu1 %1934  ;;  %v2873_v30 = vsel %vm2378_vm6, %v2872_v56, %v2868_v39  ;;  %v2907_v39 = vrot.slane %v2151_v26, %v5318_v63 }
 0x232   :  { %v2551_v22 = vrot.slane %v1935_v4, %v5100_v19 }
 0x234   :  { %v2552_v51 = vsel %vm2371_vm5, %v2551_v22, %v2547_v36 }
 0x235   :  { %v5535_v58 = vpop.xlane.xlu0 %1973  ;;  %v2557_v13 = vsel %vm2378_vm6, %v2556_v49, %v2552_v51  ;;  %v2136_v33 = vpop.xlane.xlu1 %2135 }
 0x236   :  { %v2562_v48 = vsel %vm2385_vm7, %v2561_v28, %v2557_v13  ;;  %v2882_v34 = vrot.slane %v2136_v33, %v5164_v45 }
 0x239   :  { %v5541_v10 = vpop.xlane.xlu0 %2171  ;;  %v2133_v35 = vpop.xlane.xlu1 %2132 }
 0x23a   :  { %v2877_v21 = vrot.slane %v2133_v35, %v5151_v31 }
 0x23c   :  { %v2878_v50 = vsel %vm2385_vm7, %v2877_v21, %v2873_v30  ;;  %v2912_v30 = vrot.slane %v2154_v38, %v5321_v42 }
 0x23d   :  { %v5545_v1 = vpop.xlane.xlu0 %2168  ;;  %v1944_v11 = vpop.xlane.xlu1 %1943  ;;  %v2883_v16 = vsel %vm2392_vm8, %v2882_v34, %v2878_v50 }
 0x23e   :  { %v2566_v47 = vrot.slane %v1944_v11, %v5164_v45 }
 0x240   :  { %v2567_v62 = vsel %vm2392_vm8, %v2566_v47, %v2562_v48 }
 0x241   :  { %v5550_v53 = vpop.xlane.xlu0 %1979  ;;  %v2142_v27 = vpop.xlane.xlu1 %2141 }
 0x242   :  { %v2892_v17 = vrot.slane %v2142_v27, %v5208_v6 }
 0x245   :  { %v5553_v2 = vpop.xlane.xlu0 %1976  ;;  %v2139_v18 = vpop.xlane.xlu1 %2138 }
 0x246   :  { %v2887_v32 = vrot.slane %v2139_v18, %v5205_v41 }
 0x248   :  { %v2888_v37 = vsel %vm2399_vm9, %v2887_v32, %v2883_v16 }
 0x249   :  { %v5557_v20 = vpop.xlane.xlu0 %2177  ;;  %v1950_v52 = vpop.xlane.xlu1 %1949  ;;  %v2893_v15 = vsel %vm2406_vm10, %v2892_v17, %v2888_v37 }
 0x24a   :  { %v2576_v16 = vrot.slane %v1950_v52, %v5208_v6 }
 0x24d   :  { %v2175_v12 = vpop.xlane.xlu0 %2174  ;;  %v1947_v40 = vpop.xlane.xlu1 %1946 }
 0x24e   :  { %v2571_v26 = vrot.slane %v1947_v40, %v5205_v41 }
 0x250   :  { %v2572_v50 = vsel %vm2399_vm9, %v2571_v26, %v2567_v62  ;;  %v2936_v26 = vrot.slane %v5545_v1, %v5078_v29 }
 0x251   :  { %v5561_v59 = vpop.xlane.xlu0 %2183  ;;  %v2148_v7 = vpop.xlane.xlu1 %2147  ;;  %v2577_v27 = vsel %vm2406_vm10, %v2576_v16, %v2572_v50  ;;  %v2941_v50 = vrot.slane %v5541_v10, %v5094_v24  ;;  %v2946_v16 = vrot.slane %v2175_v12, %v5100_v19  ;;  %v2951_v10 = vrot.slane %v5557_v20, %v5104_v9 }
 0x252   :  { %v2902_v55 = vrot.slane %v2148_v7, %v5261_v25  ;;  %v2620_v12 = vrot.slane %v5553_v2, %v5078_v29 }
 0x255   :  { %v5563_v36 = vpop.xlane.xlu0 %2180  ;;  %v2145_v44 = vpop.xlane.xlu1 %2144 }
 0x256   :  { %v2897_v60 = vrot.slane %v2145_v44, %v5258_v57 }
 0x258   :  { %v2898_v4 = vsel %vm2413_vm11, %v2897_v60, %v2893_v15 }
 0x259   :  { %v5567_v56 = vpop.xlane.xlu0 %1991  ;;  %v2903_v22 = vsel %vm2420_vm12, %v2902_v55, %v2898_v4  ;;  %v1956_v49 = vpop.xlane.xlu1 %1955 }
 0x25a   :  { %v2908_v28 = vsel %vm2427_vm13, %v2907_v39, %v2903_v22  ;;  %v2586_v37 = vrot.slane %v1956_v49, %v5261_v25 }
 0x25b   :  { %v5577_v13 = vsel %vm2434_vm14, %v2912_v30, %v2908_v28  ;;  %v2931_v28 = vrot.slane %v5529_v54, %v5068_v61 }
 0x25d   :  { %v5574_v51 = vpop.xlane.xlu0 %1988  ;;  %v1953_v33 = vpop.xlane.xlu1 %1952 }
 0x25e   :  { %v2581_v11 = vrot.slane %v1953_v33, %v5258_v57 }
 0x260   :  { %v2582_v32 = vsel %vm2413_vm11, %v2581_v11, %v2577_v27 }
 0x261   :  { %v5579_v48 = vpop.xlane.xlu0 %2189  ;;  %v1962_v35 = vpop.xlane.xlu1 %1961  ;;  %v2587_v40 = vsel %vm2420_vm12, %v2586_v37, %v2582_v32 }
 0x262   :  { %v2596_v52 = vrot.slane %v1962_v35, %v5321_v42 }
 0x265   :  { %v5581_v21 = vpop.xlane.xlu0 %2186  ;;  %v1959_v34 = vpop.xlane.xlu1 %1958 }
 0x266   :  { %v2591_v17 = vrot.slane %v1959_v34, %v5318_v63 }
 0x268   :  { %v2592_v7 = vsel %vm2427_vm13, %v2591_v17, %v2587_v40  ;;  %v2615_v17 = vrot.slane %v5535_v58, %v5068_v61  ;;  %v2625_v58 = vrot.slane %v5550_v53, %v5094_v24  ;;  %v2645_v53 = vrot.slane %v5567_v56, %v5164_v45 }
 0x269   :  { %v5584_v38 = vpop.xlane.xlu0 %1997  ;;  %v5589_v47 = vpop.xlane.xlu1 %2156  ;;  %v2597_v39 = vsel %vm2434_vm14, %v2596_v52, %v2592_v7 }
 0x26d   :  { %v5592_v18 = vpop.xlane.xlu0 %1994  ;;  %v1968_v15 = vpop.xlane.xlu1 %1967 }
 0x26e   :  { %v2606_v55 = vrot.slane %v1968_v15, %v5332_v5 }
 0x271   :  { %v5598_v62 = vpop.xlane.xlu0 %2192  ;;  %v1965_v44 = vpop.xlane.xlu1 %1964 }
 0x272   :  { %v2601_v60 = vrot.slane %v1965_v44, %v5339_v14 }
 0x274   :  { %v2602_v30 = vsel %vm2441_vm15, %v2601_v60, %v2597_v39  ;;  %v2961_v60 = vrot.slane %v5561_v59, %v5164_v45  ;;  %v2966_v59 = vrot.slane %v5581_v21, %v5205_v41  ;;  %v2971_v45 = vrot.slane %v5579_v48, %v5208_v6 }
 0x275   :  { %v5605_v4 = vpop.xlane.xlu0 %2003  ;;  %v2607_v22 = vsel %vm2448_vm0, %v2606_v55, %v2602_v30  ;;  %v2163_v49 = vpop.xlane.xlu1 %2162 }
 0x276   :  { %v5612_v33 = vsel %vm3005_vm1, %v2607_v22, %v5513_v23  ;;  %v2927_v35 = vrot.slane %v2163_v49, %v5065_v8 }
 0x278   :  { %v2932_v11 = vsel %vm2350_vm2, %v2931_v28, %v2927_v35 }
 0x279   :  { %v2001_v34 = vpop.xlane.xlu0 %2000  ;;  %v2937_v27 = vsel %vm2357_vm3, %v2936_v26, %v2932_v11  ;;  %v1971_v32 = vpop.xlane.xlu1 %1970 }
 0x27a   :  { %v2942_v54 = vsel %vm2364_vm4, %v2941_v50, %v2937_v27  ;;  %v2611_v23 = vrot.slane %v1971_v32, %v5065_v8  ;;  %v2956_v8 = vrot.slane %v5563_v36, %v5151_v31  ;;  %v2640_v36 = vrot.slane %v5574_v51, %v5151_v31 }
 0x27b   :  { %v2947_v1 = vsel %vm2371_vm5, %v2946_v16, %v2942_v54  ;;  %v2655_v31 = vrot.slane %v5584_v38, %v5208_v6  ;;  %v2660_v21 = vrot.slane %v2001_v34, %v5258_v57  ;;  %v2680_v38 = vrot.slane %v5168_v0, %v5339_v14 }
 0x27c   :  { %v2616_v15 = vsel %vm2350_vm2, %v2615_v17, %v2611_v23  ;;  %v2952_v7 = vsel %vm2378_vm6, %v2951_v10, %v2947_v1  ;;  %v2976_v34 = vrot.slane %v5598_v62, %v5258_v57  ;;  %v2685_v32 = vrot.slane %v5181_v3, %v5332_v5  ;;  %v2209_v10 = vld [vmem:[%s5722_s2] sm:$0xff] }
 0x27d   :  { %v2010_v37 = vpop.xlane.xlu0 %2009  ;;  %v1986_v40 = vpop.xlane.xlu1 %1985  ;;  %v2621_v61 = vsel %vm2357_vm3, %v2620_v12, %v2616_v15  ;;  %v2957_v44 = vsel %vm2385_vm7, %v2956_v8, %v2952_v7  ;;  %vm3007_vm2 = vcmask 1043459   ;;  %vm3009_vm3 = vcmask 1044484  }
 0x27e   :  { %v2635_v29 = vrot.slane %v1986_v40, %v5104_v9  ;;  %v2626_v2 = vsel %vm2364_vm4, %v2625_v58, %v2621_v61  ;;  %v2962_v39 = vsel %vm2392_vm8, %v2961_v60, %v2957_v44  ;;  %v2650_v9 = vrot.slane %v5592_v18, %v5205_v41 }
 0x27f   :  { %v2967_v51 = vsel %vm2399_vm9, %v2966_v59, %v2962_v39  ;;  %v2665_v41 = vrot.slane %v5605_v4, %v5261_v25  ;;  %v2675_v16 = vrot.slane %v2010_v37, %v5321_v42  ;;  %vm3011_vm4 = vcmask 1045509  }
 0x280   :  { %v2972_v50 = vsel %vm2406_vm10, %v2971_v45, %v2967_v51 }
 0x281   :  { %v2007_v52 = vpop.xlane.xlu0 %2006  ;;  %v1983_v20 = vpop.xlane.xlu1 %1982  ;;  %v2977_v23 = vsel %vm2413_vm11, %v2976_v34, %v2972_v50 }
 0x282   :  { %v2630_v55 = vrot.slane %v1983_v20, %v5100_v19  ;;  %v2670_v35 = vrot.slane %v2007_v52, %v5318_v63 }
 0x284   :  { %v2631_v30 = vsel %vm2371_vm5, %v2630_v55, %v2626_v2  ;;  %vm3013_vm5 = vcmask 1046534  }
 0x285   :  { %v2202_v24 = vpop.xlane.xlu0 %2201  ;;  %v2636_v19 = vsel %vm2378_vm6, %v2635_v29, %v2631_v30  ;;  %v2196_v22 = vpop.xlane.xlu1 %2195  ;;  %vm3015_vm6 = vcmask 1047559  }
 0x286   :  { %v2641_v49 = vsel %vm2385_vm7, %v2640_v36, %v2636_v19  ;;  %v2981_v6 = vrot.slane %v2196_v22, %v5261_v25  ;;  %v2991_v54 = vrot.slane %v2202_v24, %v5321_v42  ;;  %v2917_v25 = vrot.slane %v5589_v47, %v5339_v14 }
 0x287   :  { %v2646_v28 = vsel %vm2392_vm8, %v2645_v53, %v2641_v49  ;;  %vm2210_vm7 = vcmp.eq.s32.totalorder %v2209_v10, 0 }
 0x288   :  { %v2651_v56 = vsel %vm2399_vm9, %v2650_v9, %v2646_v28  ;;  %v2982_v17 = vsel %vm2420_vm12, %v2981_v6, %v2977_v23  ;;  %v2918_v15 = vsel %vm2441_vm15, %v2917_v25, %v5577_v13 }
 0x289   :  { %v2656_v18 = vsel %vm2406_vm10, %v2655_v31, %v2651_v56  ;;  %v2199_v26 = vpop.xlane.xlu1 %2198  ;;  %v2205_v48 = vpop.xlane.xlu0 %2204 }
 0x28a   :  { %v2661_v11 = vsel %vm2413_vm11, %v2660_v21, %v2656_v18  ;;  %v2986_v4 = vrot.slane %v2199_v26, %v5318_v63  ;;  %v2996_v63 = vrot.slane %v2205_v48, %v5339_v14 }
 0x28b   :  { %v2666_v27 = vsel %vm2420_vm12, %v2665_v41, %v2661_v11 }
 0x28c   :  { %v2671_v0 = vsel %vm2427_vm13, %v2670_v35, %v2666_v27  ;;  %v2987_v42 = vsel %vm2427_vm13, %v2986_v4, %v2982_v17 }
 0x28d   :  { %v2676_v57 = vsel %vm2434_vm14, %v2675_v16, %v2671_v0  ;;  %v2160_v62 = vpop.xlane.xlu1 %2159  ;;  %v2992_v47 = vsel %vm2434_vm14, %v2991_v54, %v2987_v42 }
 0x28e   :  { %v2681_v1 = vsel %vm2441_vm15, %v2680_v38, %v2676_v57  ;;  %v2922_v3 = vrot.slane %v2160_v62, %v5332_v5  ;;  %v2997_v12 = vsel %vm2441_vm15, %v2996_v63, %v2992_v47 }
 0x28f   :  { %v2686_v37 = vsel %vm2448_vm0, %v2685_v32, %v2681_v1 }
 0x290   :  { %v3008_v14 = vsel %vm3007_vm2, %v2686_v37, %v5612_v33  ;;  %v2923_v8 = vsel %vm2448_vm0, %v2922_v3, %v2918_v15 }
 0x291   :  { %v2208_v40 = vpop.xlane.xlu1 %2207  ;;  %v3010_v7 = vsel %vm3009_vm3, %v5364_v43, %v3008_v14  ;;  %v3182_v43 = vld [vmem:[%s5723_s3] ss:$0 sm:$0xff] }
 0x292   :  { %v3001_v52 = vrot.slane %v2208_v40, %v5332_v5  ;;  %v3012_v61 = vsel %vm3011_vm4, %v5508_v46, %v3010_v7 }
 0x293   :  { %v3014_v58 = vsel %vm3013_vm5, %v2923_v8, %v3012_v61 }
 0x294   :  { %v3002_v33 = vsel %vm2448_vm0, %v3001_v52, %v2997_v12 }
 0x295   :  { %v3016_v44 = vsel %vm3015_vm6, %v3002_v33, %v3014_v58 }
 0x296   :  { %v3018_v20 = vsel %vm2210_vm7, -1e+10, %v3016_v44 }
 0x297   :  { %3019 = vmax.xlane.f32.xlu0 %v3018_v20 }
 0x324   :  { %v3020_v13 = vpop.xlane.xlu0 %3019 }
 0x325   :  { %v3021_v60 = vsub.f32 %v3018_v20, %v3020_v13 }
 0x327   :  { %v3022_v55 = vmul.f32 1.442695, %v3021_v60 }
 0x329   :  { %3811 = vpow2.f32 %v3022_v55 }
 0x333   :  { %v3812_v29 = vpop.eup %3811 }
 0x334   :  { %v3031_v5 = vmul.f32 %v3812_v29, %v3182_v43 }
 0x336   :  { %3032 = vadd.xlane.f32.xlu1 %v3031_v5 }
 0x3c3   :  { %v3033_v46 = vpop.xlane.xlu1 %3032 }
 0x3c4   :  { %3813 = vrcp.f32 %v3033_v46 }
 0x3ce   :  { %v3814_v2 = vpop.eup %3813 }
 0x3cf   :  { %v3035_v36 = vmul.f32 %v3814_v2, %v3031_v5 }
 0x3d1   :  { %3036 = vst [vmem:[#allocation3] sm:$0xff] %v3035_v36 }
 0x3d2   :  { %3828 = shalt.err (!%p3825_p4)
}
 0x3d3   :  { %s3829_s16 = scalar_lea.hbm %s5728_s8, 128 }
 0x3d4   :  { %p3830_p5 = scmp.ne.s32.totalorder %s5728_s8, %s3829_s16  ;;  %p3833_p6 = scmp.lt.u32.totalorder %s3829_s16, %s5728_s8 }
 0x3d6   :  { %p3835_p7 = pnand %p3833_p6, %p3830_p5 }
 0x3d8   :  { %3838 = shalt.err (!%p3835_p7)
}
 0x3d9   :  { %3046 = dma.vmem_to_hbm [thread:$0]  %s3044_s13, 128, %s5728_s8, [#allocation4]  }
 0x3da   :  { %3839 = dma.done.wait [#allocation4], 128  }
 0x3db   :  { %3840 = vsyncadd [#allocation4], 4294967168 }
 0x3dc   :  { %3050 = vsyncpa [#allocation4], 1 }

</bundles_post_ra>
